<compile_context>
chip_gen: v7x
topology: tpu7x:2x2x1
jax: 0.10.0
libtpu: 0.0.40
codegen_flags: <defaults>
</compile_context>

<pallas_src>
import functools

import jax
import jax.numpy as jnp
import numpy as np
from jax import lax
from jax.experimental import pallas as pl
from jax.experimental.pallas import tpu as pltpu

HIDDEN = 100        # real hidden size (PyTorch model)
HIDDEN_PAD = 128    # padded hidden size (lane-aligned)
NUM_LAYERS = 4


# ---------------------------------------------------------------------------
# Fused kernel: grid = (layer,); time recurrence is an in-kernel fori_loop.
# Everything (activations, hoisted projections, state) stays resident in VMEM.
# ---------------------------------------------------------------------------
def _fused_lstm_kernel(x_hbm_ref, wih_ref, whh_ref, b_ref, wd_ref, bd_ref,
                       out_ref, act_ref, gi_ref, copy_sem,
                       *, seq_len, pred_len, out_dim, unroll):
    l = pl.program_id(0)
    n_layers = pl.num_programs(0)
    T, Bp, Hp = act_ref.shape
    G = 4 * Hp

    # Layer 0: single DMA of the (padded) network input straight into the
    # activation scratch (input BlockSpec is memory_space=pl.ANY -> HBM ref).
    @pl.when(l == 0)
    def _():
        cp = pltpu.make_async_copy(x_hbm_ref, act_ref, copy_sem)
        cp.start()
        cp.wait()

    # Hoist the full input projection off the serial path: one big MXU matmul
    # per layer, gi = X @ W_ih^T + (b_ih + b_hh) (bias folded at pack time).
    inp = act_ref[...].reshape(seq_len * Bp, Hp).astype(jnp.bfloat16)   # tile-exact reshape
    gi = jnp.dot(inp, wih_ref[...], preferred_element_type=jnp.float32) + b_ref[...]
    gi_ref[...] = gi.reshape(seq_len, Bp, G).astype(jnp.bfloat16)       # bf16 resident buffer

    whh = whh_ref[...]                                                  # (Hp, 4Hp) bf16, hoisted load

    # Serial recurrence: only the (Bp,Hp)x(Hp,4Hp) hidden projection + gate math
    # remains per step.  Unrolled so non-dependent loads/stores hide under the chain.
    def step(t, carry):
        h, c = carry
        gates = gi_ref[t].astype(jnp.float32) + jnp.dot(
            h.astype(jnp.bfloat16), whh, preferred_element_type=jnp.float32)  # (Bp, 4Hp)

        # PyTorch gate order: i, f, g, o — lane-tile aligned 128-wide slices.
        i_g = jax.nn.sigmoid(gates[:, 0 * Hp:1 * Hp])
        f_g = jax.nn.sigmoid(gates[:, 1 * Hp:2 * Hp])
        g_g = jnp.tanh(gates[:, 2 * Hp:3 * Hp])
        o_g = jax.nn.sigmoid(gates[:, 3 * Hp:4 * Hp])

        c_new = f_g * c + i_g * g_g
        h_new = o_g * jnp.tanh(c_new)
        act_ref[t] = h_new                      # input of the next layer (VMEM only)
        return h_new, c_new

    h0 = jnp.zeros((Bp, Hp), jnp.float32)
    c0 = jnp.zeros((Bp, Hp), jnp.float32)
    lax.fori_loop(0, seq_len, step, (h0, c0), unroll=unroll)

    # Final layer: dense head on the last pred_len steps only (output_dim tiny ->
    # VPU lane-reduction, no degenerate 1-wide MXU matmul), then the single HBM write.
    @pl.when(l == n_layers - 1)
    def _():
        hs = act_ref[pl.ds(seq_len - pred_len, pred_len)]               # (pred_len, Bp, Hp)
        w = wd_ref[...]                                                 # (O, Hp), zero-padded, f32
        bvec = bd_ref[...]                                              # (1, O)
        cols = [jnp.sum(hs * w[oc:oc + 1, :].reshape(1, 1, Hp),
                        axis=-1, keepdims=True)
                for oc in range(out_dim)]
        y = cols[0] if out_dim == 1 else jnp.concatenate(cols, axis=-1)
        out_ref[...] = (y + bvec.reshape(1, 1, out_dim)).astype(out_ref.dtype)


# ---------------------------------------------------------------------------
# Parameter init / packing (PyTorch-style uniform(-1/sqrt(H), 1/sqrt(H)),
# gate order i,f,g,o, each gate block zero-padded from H=100 to Hp=128).
# ---------------------------------------------------------------------------
def _pad_gate_cols(m, h, hp):
    """m: (rows, 4h) -> (rows, 4hp); each of the 4 gate blocks zero-padded to hp cols."""
    parts = []
    for g in range(4):
        blk = m[:, g * h:(g + 1) * h]
        parts.append(jnp.pad(blk, ((0, 0), (0, hp - h))))
    return jnp.concatenate(parts, axis=1)


def init_params(key, input_dim, hidden=HIDDEN, hidden_pad=HIDDEN_PAD, output_dim=1):
    k = 1.0 / jnp.sqrt(jnp.float32(hidden))
    in_dims = [input_dim] + [hidden] * (NUM_LAYERS - 1)
    keys = jax.random.split(key, NUM_LAYERS * 4 + 2)
    wih_l, whh_l, b_l = [], [], []
    idx = 0
    for d_in in in_dims:
        w_ih = jax.random.uniform(keys[idx], (4 * hidden, d_in), jnp.float32, -k, k); idx += 1
        w_hh = jax.random.uniform(keys[idx], (4 * hidden, hidden), jnp.float32, -k, k); idx += 1
        b_ih = jax.random.uniform(keys[idx], (4 * hidden,), jnp.float32, -k, k); idx += 1
        b_hh = jax.random.uniform(keys[idx], (4 * hidden,), jnp.float32, -k, k); idx += 1

        wih_t = _pad_gate_cols(w_ih.T, hidden, hidden_pad)              # (d_in, 4Hp)
        wih_t = jnp.pad(wih_t, ((0, hidden_pad - d_in), (0, 0)))        # (Hp, 4Hp)
        whh_t = _pad_gate_cols(w_hh.T, hidden, hidden_pad)              # (H, 4Hp)
        whh_t = jnp.pad(whh_t, ((0, hidden_pad - hidden), (0, 0)))      # (Hp, 4Hp)
        b = _pad_gate_cols((b_ih + b_hh).reshape(1, 4 * hidden),
                           hidden, hidden_pad)                          # (1, 4Hp) folded bias
        wih_l.append(wih_t); whh_l.append(whh_t); b_l.append(b)

    w_d = jax.random.uniform(keys[idx], (output_dim, hidden), jnp.float32, -k, k); idx += 1
    b_d = jax.random.uniform(keys[idx], (output_dim,), jnp.float32, -k, k)

    return {
        "wih": jnp.stack(wih_l).astype(jnp.bfloat16),                   # (L, Hp, 4Hp) MXU-native
        "whh": jnp.stack(whh_l).astype(jnp.bfloat16),                   # (L, Hp, 4Hp) MXU-native
        "b": jnp.stack(b_l),                                            # (L, 1, 4Hp) f32 folded bias
        "dense_w": jnp.pad(w_d, ((0, 0), (0, hidden_pad - hidden))),    # (O, Hp) f32
        "dense_b": b_d.reshape(1, output_dim),                          # (1, O)  f32
    }


# ---------------------------------------------------------------------------
# Forward pass
# ---------------------------------------------------------------------------
@functools.partial(jax.jit, static_argnames=("pred_len",))
def lstm_time_series_forward(params, x, pred_len):
    # x: (B, T, input_dim), batch_first like nn.LSTM(batch_first=True)
    B, T, D = x.shape
    L, Hp, G = params["wih"].shape
    O = params["dense_w"].shape[0]
    Bp = max(8, ((B + 7) // 8) * 8)   # pad batch to a full sublane group

    # (T, Bp, Hp) zero-padded input: padded channels / batch rows are exact zeros,
    # and padded weight rows are zero, so numerics match the unpadded model.
    x_p = jnp.zeros((T, Bp, Hp), jnp.float32)
    x_p = x_p.at[:, :B, :D].set(jnp.transpose(x.astype(jnp.float32), (1, 0, 2)))

    # Unroll the in-kernel time loop (full unroll for small T).
    unroll = True if T <= 32 else (4 if T % 4 == 0 else (2 if T % 2 == 0 else 1))

    kernel = functools.partial(_fused_lstm_kernel,
                               seq_len=T, pred_len=pred_len, out_dim=O, unroll=unroll)

    # Size scoped VMEM from T (v5e default is only 16 MiB): act f32 + gi bf16 +
    # double-buffered bf16 weights + headroom.
    scratch_bytes = T * Bp * Hp * 4 + T * Bp * G * 2
    weight_bytes = 2 * 2 * (Hp * G * 2)
    vmem_limit = int(min(100 << 20, max(32 << 20, scratch_bytes + weight_bytes + (8 << 20))))

    out = pl.pallas_call(
        kernel,
        out_shape=jax.ShapeDtypeStruct((pred_len, Bp, O), jnp.float32),
        grid_spec=pltpu.PrefetchScalarGridSpec(
            num_scalar_prefetch=0,
            grid=(L,),
            in_specs=[
                pl.BlockSpec(memory_space=pl.ANY),                 # padded input stays in HBM
                pl.BlockSpec((None, Hp, G), lambda l: (l, 0, 0)),  # W_ih^T of layer l (bf16)
                pl.BlockSpec((None, Hp, G), lambda l: (l, 0, 0)),  # W_hh^T of layer l (bf16)
                pl.BlockSpec((None, 1, G), lambda l: (l, 0, 0)),   # folded bias of layer l (f32)
                pl.BlockSpec((O, Hp), lambda l: (0, 0)),           # dense weight
                pl.BlockSpec((1, O), lambda l: (0, 0)),            # dense bias
            ],
            out_specs=pl.BlockSpec((pred_len, Bp, O), lambda l: (0, 0, 0)),
            scratch_shapes=[
                pltpu.VMEM((T, Bp, Hp), jnp.float32),    # layer activations (VMEM-resident)
                pltpu.VMEM((T, Bp, G), jnp.bfloat16),    # hoisted input projections (bf16)
                pltpu.SemaphoreType.DMA(()),             # layer-0 input DMA
            ],
        ),
        compiler_params=pltpu.CompilerParams(
            dimension_semantics=("arbitrary",),          # layer recurrence is serial
            vmem_limit_bytes=vmem_limit,
        ),
    )(x_p, params["wih"], params["whh"], params["b"],
      params["dense_w"], params["dense_b"])

    # (pred_len, Bp, O) -> (B, pred_len, O)
    return jnp.transpose(out[:, :B, :], (1, 0, 2))


# ---------------------------------------------------------------------------
# Pure-JAX reference (same padded math, same bf16 rounding points) for a
# correctness check against the kernel.
# ---------------------------------------------------------------------------
def _lstm_ref(params, x, pred_len):
    B, T, D = x.shape
    L, Hp, G = params["wih"].shape
    h_in = jnp.pad(x.astype(jnp.float32), ((0, 0), (0, 0), (0, Hp - D)))  # (B, T, Hp)
    for layer in range(L):
        wih = params["wih"][layer]           # bf16 (Hp, 4Hp)
        whh = params["whh"][layer]           # bf16 (Hp, 4Hp)
        b = params["b"][layer][0]            # f32  (4Hp,)

        gi = jnp.dot(h_in.astype(jnp.bfloat16), wih,
                     preferred_element_type=jnp.float32) + b             # (B, T, 4Hp)
        gi = gi.astype(jnp.bfloat16)

        def step(carry, gi_t, whh=whh):
            h, c = carry
            gates = gi_t.astype(jnp.float32) + jnp.dot(
                h.astype(jnp.bfloat16), whh, preferred_element_type=jnp.float32)
            i = jax.nn.sigmoid(gates[:, 0 * Hp:1 * Hp])
            f = jax.nn.sigmoid(gates[:, 1 * Hp:2 * Hp])
            g = jnp.tanh(gates[:, 2 * Hp:3 * Hp])
            o = jax.nn.sigmoid(gates[:, 3 * Hp:4 * Hp])
            c = f * c + i * g
            h = o * jnp.tanh(c)
            return (h, c), h

        init = (jnp.zeros((B, Hp), jnp.float32), jnp.zeros((B, Hp), jnp.float32))
        _, hs = jax.lax.scan(step, init, jnp.transpose(gi, (1, 0, 2)))
        h_in = jnp.transpose(hs, (1, 0, 2))
    y = h_in @ params["dense_w"].T + params["dense_b"]
    return y[:, -pred_len:, :]


if __name__ == "__main__":
    B, T, input_dim = 2, 8, 4
    pred_len = 4
    output_dim = 1

    key = jax.random.PRNGKey(0)
    pkey, xkey = jax.random.split(key)
    params = init_params(pkey, input_dim, HIDDEN, HIDDEN_PAD, output_dim)
    x = jax.random.normal(xkey, (B, T, input_dim), dtype=jnp.float32)

    out = lstm_time_series_forward(params, x, pred_len=pred_len)
    jax.block_until_ready(out)
    assert out.shape == (B, pred_len, output_dim), out.shape

    ref = _lstm_ref(params, x, pred_len)
    np.testing.assert_allclose(np.asarray(out), np.asarray(ref), rtol=5e-3, atol=5e-3)

    print("KERNEL_OK")
</pallas_src>

<mosaic_0001>
module attributes {stable_mosaic.version = 11 : i64} {
  func.func @_fused_lstm_kernel(%arg0: i32, %arg1: memref<8x8x128xf32, #tpu.memory_space<any>>, %arg2: memref<1x128x512xbf16, #tpu.memory_space<vmem>>, %arg3: memref<1x128x512xbf16, #tpu.memory_space<vmem>>, %arg4: memref<1x1x512xf32, #tpu.memory_space<vmem>>, %arg5: memref<1x128xf32, #tpu.memory_space<vmem>>, %arg6: memref<1x1xf32, #tpu.memory_space<vmem>>, %arg7: memref<4x8x1xf32, #tpu.memory_space<vmem>>, %arg8: memref<8x8x128xf32, #tpu.memory_space<vmem>>, %arg9: memref<8x8x512xbf16, #tpu.memory_space<vmem>>, %arg10: memref<!tpu.dma_semaphore, #tpu.memory_space<semaphore_mem>>) attributes {dimension_semantics = [#tpu.dimension_semantics<arbitrary>], iteration_bounds = array<i64: 4>, scalar_prefetch = 0 : i64, scratch_operands = 3 : i64, tpu.core_type = #tpu.core_type<tc>, window_params = [{}, {transform_indices = @transform_1, window_bounds = array<i64: 1, 128, 512>}, {transform_indices = @transform_2, window_bounds = array<i64: 1, 128, 512>}, {transform_indices = @transform_3, window_bounds = array<i64: 1, 1, 512>}, {pipeline_mode = #tpu.pipeline_mode<synchronous>, transform_indices = @transform_4, window_bounds = array<i64: 1, 128>}, {pipeline_mode = #tpu.pipeline_mode<synchronous>, transform_indices = @transform_5, window_bounds = array<i64: 1, 1>}, {pipeline_mode = #tpu.pipeline_mode<synchronous>, transform_indices = @transform_6, window_bounds = array<i64: 4, 8, 1>}]} {
    %c0_i32 = arith.constant 0 : i32
    %0 = arith.cmpi eq, %arg0, %c0_i32 : i32
    %1 = arith.extui %0 : i1 to i32
    %c0_i32_0 = arith.constant 0 : i32
    %2 = arith.cmpi ne, %1, %c0_i32_0 : i32
    scf.if %2 {
      tpu.enqueue_dma source(%arg1 : memref<8x8x128xf32, #tpu.memory_space<any>>) target(%arg8 : memref<8x8x128xf32, #tpu.memory_space<vmem>>) target_semaphore(%arg10 : memref<!tpu.dma_semaphore, #tpu.memory_space<semaphore_mem>>)
      tpu.wait_dma2 semaphore(%arg10 : memref<!tpu.dma_semaphore, #tpu.memory_space<semaphore_mem>>) src(%arg1 : memref<8x8x128xf32, #tpu.memory_space<any>>) dst(%arg8 : memref<8x8x128xf32, #tpu.memory_space<vmem>>)
    } else {
    }
    %c0 = arith.constant 0 : index
    %c0_1 = arith.constant 0 : index
    %c0_2 = arith.constant 0 : index
    %3 = vector.load %arg8[%c0, %c0_1, %c0_2] : memref<8x8x128xf32, #tpu.memory_space<vmem>>, vector<8x8x128xf32>
    %4 = vector.shape_cast %3 : vector<8x8x128xf32> to vector<64x128xf32>
    %5 = arith.truncf %4 : vector<64x128xf32> to vector<64x128xbf16>
    %c0_3 = arith.constant 0 : index
    %c0_4 = arith.constant 0 : index
    %c0_5 = arith.constant 0 : index
    %6 = vector.load %arg2[%c0_3, %c0_4, %c0_5] : memref<1x128x512xbf16, #tpu.memory_space<vmem>>, vector<1x128x512xbf16>
    %7 = vector.shape_cast %6 : vector<1x128x512xbf16> to vector<128x512xbf16>
    %cst = arith.constant dense<0.000000e+00> : vector<64x512xf32>
    %8 = tpu.matmul %5, %7, %cst {dimension_numbers = #tpu.dot_dimension_numbers<[1], [0], [0], [1], [0, 0, 1, 1], [], []>} : vector<64x128xbf16>, vector<128x512xbf16>, vector<64x512xf32> -> vector<64x512xf32>
    %c0_6 = arith.constant 0 : index
    %c0_7 = arith.constant 0 : index
    %c0_8 = arith.constant 0 : index
    %9 = vector.load %arg4[%c0_6, %c0_7, %c0_8] : memref<1x1x512xf32, #tpu.memory_space<vmem>>, vector<1x1x512xf32>
    %10 = vector.shape_cast %9 : vector<1x1x512xf32> to vector<1x512xf32>
    %11 = vector.broadcast %10 : vector<1x512xf32> to vector<64x512xf32>
    %12 = arith.addf %8, %11 : vector<64x512xf32>
    %13 = vector.shape_cast %12 : vector<64x512xf32> to vector<8x8x512xf32>
    %14 = arith.truncf %13 : vector<8x8x512xf32> to vector<8x8x512xbf16>
    %c0_9 = arith.constant 0 : index
    %c0_10 = arith.constant 0 : index
    %c0_11 = arith.constant 0 : index
    %15 = vector.load %arg9[%c0_9, %c0_10, %c0_11] : memref<8x8x512xbf16, #tpu.memory_space<vmem>>, vector<8x8x512xbf16>
    tpu.vector_store %arg9[%c0_9, %c0_10, %c0_11], %14 {strides = array<i32>} : memref<8x8x512xbf16, #tpu.memory_space<vmem>>, vector<8x8x512xbf16>,
    %c0_12 = arith.constant 0 : index
    %c0_13 = arith.constant 0 : index
    %c0_14 = arith.constant 0 : index
    %16 = vector.load %arg3[%c0_12, %c0_13, %c0_14] : memref<1x128x512xbf16, #tpu.memory_space<vmem>>, vector<1x128x512xbf16>
    %17 = vector.shape_cast %16 : vector<1x128x512xbf16> to vector<128x512xbf16>
    %cst_15 = arith.constant 0.000000e+00 : f32
    %18 = vector.broadcast %cst_15 : f32 to vector<8x128xf32>
    %cst_16 = arith.constant 0.000000e+00 : f32
    %19 = vector.broadcast %cst_16 : f32 to vector<8x128xf32>
    %c0_i32_17 = arith.constant 0 : i32
    %20 = arith.index_cast %c0_i32_17 : i32 to index
    %c0_18 = arith.constant 0 : index
    %c0_19 = arith.constant 0 : index
    %21 = vector.load %arg9[%20, %c0_18, %c0_19] : memref<8x8x512xbf16, #tpu.memory_space<vmem>>, vector<1x8x512xbf16>
    %22 = vector.shape_cast %21 : vector<1x8x512xbf16> to vector<8x512xbf16>
    %23 = arith.extf %22 : vector<8x512xbf16> to vector<8x512xf32>
    %24 = arith.truncf %18 : vector<8x128xf32> to vector<8x128xbf16>
    %cst_20 = arith.constant dense<0.000000e+00> : vector<8x512xf32>
    %25 = tpu.matmul %24, %17, %cst_20 {dimension_numbers = #tpu.dot_dimension_numbers<[1], [0], [0], [1], [0, 0, 1, 1], [], []>} : vector<8x128xbf16>, vector<128x512xbf16>, vector<8x512xf32> -> vector<8x512xf32>
    %26 = arith.addf %23, %25 : vector<8x512xf32>
    %27 = vector.extract_strided_slice %26 {offsets = [0, 0], sizes = [8, 128], strides = [1, 1]} : vector<8x512xf32> to vector<8x128xf32>
    %28 = arith.negf %27 : vector<8x128xf32>
    %29 = math.exp %28 : vector<8x128xf32>
    %cst_21 = arith.constant 1.000000e+00 : f32
    %30 = vector.broadcast %cst_21 : f32 to vector<8x128xf32>
    %31 = arith.addf %30, %29 : vector<8x128xf32>
    %32 = arith.divf %30, %31 : vector<8x128xf32>
    %33 = vector.extract_strided_slice %26 {offsets = [0, 128], sizes = [8, 128], strides = [1, 1]} : vector<8x512xf32> to vector<8x128xf32>
    %34 = arith.negf %33 : vector<8x128xf32>
    %35 = math.exp %34 : vector<8x128xf32>
    %cst_22 = arith.constant 1.000000e+00 : f32
    %36 = vector.broadcast %cst_22 : f32 to vector<8x128xf32>
    %37 = arith.addf %36, %35 : vector<8x128xf32>
    %38 = arith.divf %36, %37 : vector<8x128xf32>
    %39 = vector.extract_strided_slice %26 {offsets = [0, 256], sizes = [8, 128], strides = [1, 1]} : vector<8x512xf32> to vector<8x128xf32>
    %40 = math.tanh %39 : vector<8x128xf32>
    %41 = vector.extract_strided_slice %26 {offsets = [0, 384], sizes = [8, 128], strides = [1, 1]} : vector<8x512xf32> to vector<8x128xf32>
    %42 = arith.negf %41 : vector<8x128xf32>
    %43 = math.exp %42 : vector<8x128xf32>
    %cst_23 = arith.constant 1.000000e+00 : f32
    %44 = vector.broadcast %cst_23 : f32 to vector<8x128xf32>
    %45 = arith.addf %44, %43 : vector<8x128xf32>
    %46 = arith.divf %44, %45 : vector<8x128xf32>
    %47 = arith.mulf %38, %19 : vector<8x128xf32>
    %48 = arith.mulf %32, %40 : vector<8x128xf32>
    %49 = arith.addf %47, %48 : vector<8x128xf32>
    %50 = math.tanh %49 : vector<8x128xf32>
    %51 = arith.mulf %46, %50 : vector<8x128xf32>
    %52 = arith.index_cast %c0_i32_17 : i32 to index
    %c0_24 = arith.constant 0 : index
    %c0_25 = arith.constant 0 : index
    %53 = vector.load %arg8[%52, %c0_24, %c0_25] : memref<8x8x128xf32, #tpu.memory_space<vmem>>, vector<1x8x128xf32>
    %54 = vector.shape_cast %53 : vector<1x8x128xf32> to vector<8x128xf32>
    %55 = vector.shape_cast %51 : vector<8x128xf32> to vector<1x8x128xf32>
    tpu.vector_store %arg8[%52, %c0_24, %c0_25], %55 {strides = array<i32>} : memref<8x8x128xf32, #tpu.memory_space<vmem>>, vector<1x8x128xf32>,
    %c1_i32 = arith.constant 1 : i32
    %56 = arith.index_cast %c1_i32 : i32 to index
    %c0_26 = arith.constant 0 : index
    %c0_27 = arith.constant 0 : index
    %57 = vector.load %arg9[%56, %c0_26, %c0_27] : memref<8x8x512xbf16, #tpu.memory_space<vmem>>, vector<1x8x512xbf16>
    %58 = vector.shape_cast %57 : vector<1x8x512xbf16> to vector<8x512xbf16>
    %59 = arith.extf %58 : vector<8x512xbf16> to vector<8x512xf32>
    %60 = arith.truncf %51 : vector<8x128xf32> to vector<8x128xbf16>
    %cst_28 = arith.constant dense<0.000000e+00> : vector<8x512xf32>
    %61 = tpu.matmul %60, %17, %cst_28 {dimension_numbers = #tpu.dot_dimension_numbers<[1], [0], [0], [1], [0, 0, 1, 1], [], []>} : vector<8x128xbf16>, vector<128x512xbf16>, vector<8x512xf32> -> vector<8x512xf32>
    %62 = arith.addf %59, %61 : vector<8x512xf32>
    %63 = vector.extract_strided_slice %62 {offsets = [0, 0], sizes = [8, 128], strides = [1, 1]} : vector<8x512xf32> to vector<8x128xf32>
    %64 = arith.negf %63 : vector<8x128xf32>
    %65 = math.exp %64 : vector<8x128xf32>
    %cst_29 = arith.constant 1.000000e+00 : f32
    %66 = vector.broadcast %cst_29 : f32 to vector<8x128xf32>
    %67 = arith.addf %66, %65 : vector<8x128xf32>
    %68 = arith.divf %66, %67 : vector<8x128xf32>
    %69 = vector.extract_strided_slice %62 {offsets = [0, 128], sizes = [8, 128], strides = [1, 1]} : vector<8x512xf32> to vector<8x128xf32>
    %70 = arith.negf %69 : vector<8x128xf32>
    %71 = math.exp %70 : vector<8x128xf32>
    %cst_30 = arith.constant 1.000000e+00 : f32
    %72 = vector.broadcast %cst_30 : f32 to vector<8x128xf32>
    %73 = arith.addf %72, %71 : vector<8x128xf32>
    %74 = arith.divf %72, %73 : vector<8x128xf32>
    %75 = vector.extract_strided_slice %62 {offsets = [0, 256], sizes = [8, 128], strides = [1, 1]} : vector<8x512xf32> to vector<8x128xf32>
    %76 = math.tanh %75 : vector<8x128xf32>
    %77 = vector.extract_strided_slice %62 {offsets = [0, 384], sizes = [8, 128], strides = [1, 1]} : vector<8x512xf32> to vector<8x128xf32>
    %78 = arith.negf %77 : vector<8x128xf32>
    %79 = math.exp %78 : vector<8x128xf32>
    %cst_31 = arith.constant 1.000000e+00 : f32
    %80 = vector.broadcast %cst_31 : f32 to vector<8x128xf32>
    %81 = arith.addf %80, %79 : vector<8x128xf32>
    %82 = arith.divf %80, %81 : vector<8x128xf32>
    %83 = arith.mulf %74, %49 : vector<8x128xf32>
    %84 = arith.mulf %68, %76 : vector<8x128xf32>
    %85 = arith.addf %83, %84 : vector<8x128xf32>
    %86 = math.tanh %85 : vector<8x128xf32>
    %87 = arith.mulf %82, %86 : vector<8x128xf32>
    %88 = arith.index_cast %c1_i32 : i32 to index
    %c0_32 = arith.constant 0 : index
    %c0_33 = arith.constant 0 : index
    %89 = vector.load %arg8[%88, %c0_32, %c0_33] : memref<8x8x128xf32, #tpu.memory_space<vmem>>, vector<1x8x128xf32>
    %90 = vector.shape_cast %89 : vector<1x8x128xf32> to vector<8x128xf32>
    %91 = vector.shape_cast %87 : vector<8x128xf32> to vector<1x8x128xf32>
    tpu.vector_store %arg8[%88, %c0_32, %c0_33], %91 {strides = array<i32>} : memref<8x8x128xf32, #tpu.memory_space<vmem>>, vector<1x8x128xf32>,
    %c2_i32 = arith.constant 2 : i32
    %92 = arith.index_cast %c2_i32 : i32 to index
    %c0_34 = arith.constant 0 : index
    %c0_35 = arith.constant 0 : index
    %93 = vector.load %arg9[%92, %c0_34, %c0_35] : memref<8x8x512xbf16, #tpu.memory_space<vmem>>, vector<1x8x512xbf16>
    %94 = vector.shape_cast %93 : vector<1x8x512xbf16> to vector<8x512xbf16>
    %95 = arith.extf %94 : vector<8x512xbf16> to vector<8x512xf32>
    %96 = arith.truncf %87 : vector<8x128xf32> to vector<8x128xbf16>
    %cst_36 = arith.constant dense<0.000000e+00> : vector<8x512xf32>
    %97 = tpu.matmul %96, %17, %cst_36 {dimension_numbers = #tpu.dot_dimension_numbers<[1], [0], [0], [1], [0, 0, 1, 1], [], []>} : vector<8x128xbf16>, vector<128x512xbf16>, vector<8x512xf32> -> vector<8x512xf32>
    %98 = arith.addf %95, %97 : vector<8x512xf32>
    %99 = vector.extract_strided_slice %98 {offsets = [0, 0], sizes = [8, 128], strides = [1, 1]} : vector<8x512xf32> to vector<8x128xf32>
    %100 = arith.negf %99 : vector<8x128xf32>
    %101 = math.exp %100 : vector<8x128xf32>
    %cst_37 = arith.constant 1.000000e+00 : f32
    %102 = vector.broadcast %cst_37 : f32 to vector<8x128xf32>
    %103 = arith.addf %102, %101 : vector<8x128xf32>
    %104 = arith.divf %102, %103 : vector<8x128xf32>
    %105 = vector.extract_strided_slice %98 {offsets = [0, 128], sizes = [8, 128], strides = [1, 1]} : vector<8x512xf32> to vector<8x128xf32>
    %106 = arith.negf %105 : vector<8x128xf32>
    %107 = math.exp %106 : vector<8x128xf32>
    %cst_38 = arith.constant 1.000000e+00 : f32
    %108 = vector.broadcast %cst_38 : f32 to vector<8x128xf32>
    %109 = arith.addf %108, %107 : vector<8x128xf32>
    %110 = arith.divf %108, %109 : vector<8x128xf32>
    %111 = vector.extract_strided_slice %98 {offsets = [0, 256], sizes = [8, 128], strides = [1, 1]} : vector<8x512xf32> to vector<8x128xf32>
    %112 = math.tanh %111 : vector<8x128xf32>
    %113 = vector.extract_strided_slice %98 {offsets = [0, 384], sizes = [8, 128], strides = [1, 1]} : vector<8x512xf32> to vector<8x128xf32>
    %114 = arith.negf %113 : vector<8x128xf32>
    %115 = math.exp %114 : vector<8x128xf32>
    %cst_39 = arith.constant 1.000000e+00 : f32
    %116 = vector.broadcast %cst_39 : f32 to vector<8x128xf32>
    %117 = arith.addf %116, %115 : vector<8x128xf32>
    %118 = arith.divf %116, %117 : vector<8x128xf32>
    %119 = arith.mulf %110, %85 : vector<8x128xf32>
    %120 = arith.mulf %104, %112 : vector<8x128xf32>
    %121 = arith.addf %119, %120 : vector<8x128xf32>
    %122 = math.tanh %121 : vector<8x128xf32>
    %123 = arith.mulf %118, %122 : vector<8x128xf32>
    %124 = arith.index_cast %c2_i32 : i32 to index
    %c0_40 = arith.constant 0 : index
    %c0_41 = arith.constant 0 : index
    %125 = vector.load %arg8[%124, %c0_40, %c0_41] : memref<8x8x128xf32, #tpu.memory_space<vmem>>, vector<1x8x128xf32>
    %126 = vector.shape_cast %125 : vector<1x8x128xf32> to vector<8x128xf32>
    %127 = vector.shape_cast %123 : vector<8x128xf32> to vector<1x8x128xf32>
    tpu.vector_store %arg8[%124, %c0_40, %c0_41], %127 {strides = array<i32>} : memref<8x8x128xf32, #tpu.memory_space<vmem>>, vector<1x8x128xf32>,
    %c3_i32 = arith.constant 3 : i32
    %128 = arith.index_cast %c3_i32 : i32 to index
    %c0_42 = arith.constant 0 : index
    %c0_43 = arith.constant 0 : index
    %129 = vector.load %arg9[%128, %c0_42, %c0_43] : memref<8x8x512xbf16, #tpu.memory_space<vmem>>, vector<1x8x512xbf16>
    %130 = vector.shape_cast %129 : vector<1x8x512xbf16> to vector<8x512xbf16>
    %131 = arith.extf %130 : vector<8x512xbf16> to vector<8x512xf32>
    %132 = arith.truncf %123 : vector<8x128xf32> to vector<8x128xbf16>
    %cst_44 = arith.constant dense<0.000000e+00> : vector<8x512xf32>
    %133 = tpu.matmul %132, %17, %cst_44 {dimension_numbers = #tpu.dot_dimension_numbers<[1], [0], [0], [1], [0, 0, 1, 1], [], []>} : vector<8x128xbf16>, vector<128x512xbf16>, vector<8x512xf32> -> vector<8x512xf32>
    %134 = arith.addf %131, %133 : vector<8x512xf32>
    %135 = vector.extract_strided_slice %134 {offsets = [0, 0], sizes = [8, 128], strides = [1, 1]} : vector<8x512xf32> to vector<8x128xf32>
    %136 = arith.negf %135 : vector<8x128xf32>
    %137 = math.exp %136 : vector<8x128xf32>
    %cst_45 = arith.constant 1.000000e+00 : f32
    %138 = vector.broadcast %cst_45 : f32 to vector<8x128xf32>
    %139 = arith.addf %138, %137 : vector<8x128xf32>
    %140 = arith.divf %138, %139 : vector<8x128xf32>
    %141 = vector.extract_strided_slice %134 {offsets = [0, 128], sizes = [8, 128], strides = [1, 1]} : vector<8x512xf32> to vector<8x128xf32>
    %142 = arith.negf %141 : vector<8x128xf32>
    %143 = math.exp %142 : vector<8x128xf32>
    %cst_46 = arith.constant 1.000000e+00 : f32
    %144 = vector.broadcast %cst_46 : f32 to vector<8x128xf32>
    %145 = arith.addf %144, %143 : vector<8x128xf32>
    %146 = arith.divf %144, %145 : vector<8x128xf32>
    %147 = vector.extract_strided_slice %134 {offsets = [0, 256], sizes = [8, 128], strides = [1, 1]} : vector<8x512xf32> to vector<8x128xf32>
    %148 = math.tanh %147 : vector<8x128xf32>
    %149 = vector.extract_strided_slice %134 {offsets = [0, 384], sizes = [8, 128], strides = [1, 1]} : vector<8x512xf32> to vector<8x128xf32>
    %150 = arith.negf %149 : vector<8x128xf32>
    %151 = math.exp %150 : vector<8x128xf32>
    %cst_47 = arith.constant 1.000000e+00 : f32
    %152 = vector.broadcast %cst_47 : f32 to vector<8x128xf32>
    %153 = arith.addf %152, %151 : vector<8x128xf32>
    %154 = arith.divf %152, %153 : vector<8x128xf32>
    %155 = arith.mulf %146, %121 : vector<8x128xf32>
    %156 = arith.mulf %140, %148 : vector<8x128xf32>
    %157 = arith.addf %155, %156 : vector<8x128xf32>
    %158 = math.tanh %157 : vector<8x128xf32>
    %159 = arith.mulf %154, %158 : vector<8x128xf32>
    %160 = arith.index_cast %c3_i32 : i32 to index
    %c0_48 = arith.constant 0 : index
    %c0_49 = arith.constant 0 : index
    %161 = vector.load %arg8[%160, %c0_48, %c0_49] : memref<8x8x128xf32, #tpu.memory_space<vmem>>, vector<1x8x128xf32>
    %162 = vector.shape_cast %161 : vector<1x8x128xf32> to vector<8x128xf32>
    %163 = vector.shape_cast %159 : vector<8x128xf32> to vector<1x8x128xf32>
    tpu.vector_store %arg8[%160, %c0_48, %c0_49], %163 {strides = array<i32>} : memref<8x8x128xf32, #tpu.memory_space<vmem>>, vector<1x8x128xf32>,
    %c4_i32 = arith.constant 4 : i32
    %164 = arith.index_cast %c4_i32 : i32 to index
    %c0_50 = arith.constant 0 : index
    %c0_51 = arith.constant 0 : index
    %165 = vector.load %arg9[%164, %c0_50, %c0_51] : memref<8x8x512xbf16, #tpu.memory_space<vmem>>, vector<1x8x512xbf16>
    %166 = vector.shape_cast %165 : vector<1x8x512xbf16> to vector<8x512xbf16>
    %167 = arith.extf %166 : vector<8x512xbf16> to vector<8x512xf32>
    %168 = arith.truncf %159 : vector<8x128xf32> to vector<8x128xbf16>
    %cst_52 = arith.constant dense<0.000000e+00> : vector<8x512xf32>
    %169 = tpu.matmul %168, %17, %cst_52 {dimension_numbers = #tpu.dot_dimension_numbers<[1], [0], [0], [1], [0, 0, 1, 1], [], []>} : vector<8x128xbf16>, vector<128x512xbf16>, vector<8x512xf32> -> vector<8x512xf32>
    %170 = arith.addf %167, %169 : vector<8x512xf32>
    %171 = vector.extract_strided_slice %170 {offsets = [0, 0], sizes = [8, 128], strides = [1, 1]} : vector<8x512xf32> to vector<8x128xf32>
    %172 = arith.negf %171 : vector<8x128xf32>
    %173 = math.exp %172 : vector<8x128xf32>
    %cst_53 = arith.constant 1.000000e+00 : f32
    %174 = vector.broadcast %cst_53 : f32 to vector<8x128xf32>
    %175 = arith.addf %174, %173 : vector<8x128xf32>
    %176 = arith.divf %174, %175 : vector<8x128xf32>
    %177 = vector.extract_strided_slice %170 {offsets = [0, 128], sizes = [8, 128], strides = [1, 1]} : vector<8x512xf32> to vector<8x128xf32>
    %178 = arith.negf %177 : vector<8x128xf32>
    %179 = math.exp %178 : vector<8x128xf32>
    %cst_54 = arith.constant 1.000000e+00 : f32
    %180 = vector.broadcast %cst_54 : f32 to vector<8x128xf32>
    %181 = arith.addf %180, %179 : vector<8x128xf32>
    %182 = arith.divf %180, %181 : vector<8x128xf32>
    %183 = vector.extract_strided_slice %170 {offsets = [0, 256], sizes = [8, 128], strides = [1, 1]} : vector<8x512xf32> to vector<8x128xf32>
    %184 = math.tanh %183 : vector<8x128xf32>
    %185 = vector.extract_strided_slice %170 {offsets = [0, 384], sizes = [8, 128], strides = [1, 1]} : vector<8x512xf32> to vector<8x128xf32>
    %186 = arith.negf %185 : vector<8x128xf32>
    %187 = math.exp %186 : vector<8x128xf32>
    %cst_55 = arith.constant 1.000000e+00 : f32
    %188 = vector.broadcast %cst_55 : f32 to vector<8x128xf32>
    %189 = arith.addf %188, %187 : vector<8x128xf32>
    %190 = arith.divf %188, %189 : vector<8x128xf32>
    %191 = arith.mulf %182, %157 : vector<8x128xf32>
    %192 = arith.mulf %176, %184 : vector<8x128xf32>
    %193 = arith.addf %191, %192 : vector<8x128xf32>
    %194 = math.tanh %193 : vector<8x128xf32>
    %195 = arith.mulf %190, %194 : vector<8x128xf32>
    %196 = arith.index_cast %c4_i32 : i32 to index
    %c0_56 = arith.constant 0 : index
    %c0_57 = arith.constant 0 : index
    %197 = vector.load %arg8[%196, %c0_56, %c0_57] : memref<8x8x128xf32, #tpu.memory_space<vmem>>, vector<1x8x128xf32>
    %198 = vector.shape_cast %197 : vector<1x8x128xf32> to vector<8x128xf32>
    %199 = vector.shape_cast %195 : vector<8x128xf32> to vector<1x8x128xf32>
    tpu.vector_store %arg8[%196, %c0_56, %c0_57], %199 {strides = array<i32>} : memref<8x8x128xf32, #tpu.memory_space<vmem>>, vector<1x8x128xf32>,
    %c5_i32 = arith.constant 5 : i32
    %200 = arith.index_cast %c5_i32 : i32 to index
    %c0_58 = arith.constant 0 : index
    %c0_59 = arith.constant 0 : index
    %201 = vector.load %arg9[%200, %c0_58, %c0_59] : memref<8x8x512xbf16, #tpu.memory_space<vmem>>, vector<1x8x512xbf16>
    %202 = vector.shape_cast %201 : vector<1x8x512xbf16> to vector<8x512xbf16>
    %203 = arith.extf %202 : vector<8x512xbf16> to vector<8x512xf32>
    %204 = arith.truncf %195 : vector<8x128xf32> to vector<8x128xbf16>
    %cst_60 = arith.constant dense<0.000000e+00> : vector<8x512xf32>
    %205 = tpu.matmul %204, %17, %cst_60 {dimension_numbers = #tpu.dot_dimension_numbers<[1], [0], [0], [1], [0, 0, 1, 1], [], []>} : vector<8x128xbf16>, vector<128x512xbf16>, vector<8x512xf32> -> vector<8x512xf32>
    %206 = arith.addf %203, %205 : vector<8x512xf32>
    %207 = vector.extract_strided_slice %206 {offsets = [0, 0], sizes = [8, 128], strides = [1, 1]} : vector<8x512xf32> to vector<8x128xf32>
    %208 = arith.negf %207 : vector<8x128xf32>
    %209 = math.exp %208 : vector<8x128xf32>
    %cst_61 = arith.constant 1.000000e+00 : f32
    %210 = vector.broadcast %cst_61 : f32 to vector<8x128xf32>
    %211 = arith.addf %210, %209 : vector<8x128xf32>
    %212 = arith.divf %210, %211 : vector<8x128xf32>
    %213 = vector.extract_strided_slice %206 {offsets = [0, 128], sizes = [8, 128], strides = [1, 1]} : vector<8x512xf32> to vector<8x128xf32>
    %214 = arith.negf %213 : vector<8x128xf32>
    %215 = math.exp %214 : vector<8x128xf32>
    %cst_62 = arith.constant 1.000000e+00 : f32
    %216 = vector.broadcast %cst_62 : f32 to vector<8x128xf32>
    %217 = arith.addf %216, %215 : vector<8x128xf32>
    %218 = arith.divf %216, %217 : vector<8x128xf32>
    %219 = vector.extract_strided_slice %206 {offsets = [0, 256], sizes = [8, 128], strides = [1, 1]} : vector<8x512xf32> to vector<8x128xf32>
    %220 = math.tanh %219 : vector<8x128xf32>
    %221 = vector.extract_strided_slice %206 {offsets = [0, 384], sizes = [8, 128], strides = [1, 1]} : vector<8x512xf32> to vector<8x128xf32>
    %222 = arith.negf %221 : vector<8x128xf32>
    %223 = math.exp %222 : vector<8x128xf32>
    %cst_63 = arith.constant 1.000000e+00 : f32
    %224 = vector.broadcast %cst_63 : f32 to vector<8x128xf32>
    %225 = arith.addf %224, %223 : vector<8x128xf32>
    %226 = arith.divf %224, %225 : vector<8x128xf32>
    %227 = arith.mulf %218, %193 : vector<8x128xf32>
    %228 = arith.mulf %212, %220 : vector<8x128xf32>
    %229 = arith.addf %227, %228 : vector<8x128xf32>
    %230 = math.tanh %229 : vector<8x128xf32>
    %231 = arith.mulf %226, %230 : vector<8x128xf32>
    %232 = arith.index_cast %c5_i32 : i32 to index
    %c0_64 = arith.constant 0 : index
    %c0_65 = arith.constant 0 : index
    %233 = vector.load %arg8[%232, %c0_64, %c0_65] : memref<8x8x128xf32, #tpu.memory_space<vmem>>, vector<1x8x128xf32>
    %234 = vector.shape_cast %233 : vector<1x8x128xf32> to vector<8x128xf32>
    %235 = vector.shape_cast %231 : vector<8x128xf32> to vector<1x8x128xf32>
    tpu.vector_store %arg8[%232, %c0_64, %c0_65], %235 {strides = array<i32>} : memref<8x8x128xf32, #tpu.memory_space<vmem>>, vector<1x8x128xf32>,
    %c6_i32 = arith.constant 6 : i32
    %236 = arith.index_cast %c6_i32 : i32 to index
    %c0_66 = arith.constant 0 : index
    %c0_67 = arith.constant 0 : index
    %237 = vector.load %arg9[%236, %c0_66, %c0_67] : memref<8x8x512xbf16, #tpu.memory_space<vmem>>, vector<1x8x512xbf16>
    %238 = vector.shape_cast %237 : vector<1x8x512xbf16> to vector<8x512xbf16>
    %239 = arith.extf %238 : vector<8x512xbf16> to vector<8x512xf32>
    %240 = arith.truncf %231 : vector<8x128xf32> to vector<8x128xbf16>
    %cst_68 = arith.constant dense<0.000000e+00> : vector<8x512xf32>
    %241 = tpu.matmul %240, %17, %cst_68 {dimension_numbers = #tpu.dot_dimension_numbers<[1], [0], [0], [1], [0, 0, 1, 1], [], []>} : vector<8x128xbf16>, vector<128x512xbf16>, vector<8x512xf32> -> vector<8x512xf32>
    %242 = arith.addf %239, %241 : vector<8x512xf32>
    %243 = vector.extract_strided_slice %242 {offsets = [0, 0], sizes = [8, 128], strides = [1, 1]} : vector<8x512xf32> to vector<8x128xf32>
    %244 = arith.negf %243 : vector<8x128xf32>
    %245 = math.exp %244 : vector<8x128xf32>
    %cst_69 = arith.constant 1.000000e+00 : f32
    %246 = vector.broadcast %cst_69 : f32 to vector<8x128xf32>
    %247 = arith.addf %246, %245 : vector<8x128xf32>
    %248 = arith.divf %246, %247 : vector<8x128xf32>
    %249 = vector.extract_strided_slice %242 {offsets = [0, 128], sizes = [8, 128], strides = [1, 1]} : vector<8x512xf32> to vector<8x128xf32>
    %250 = arith.negf %249 : vector<8x128xf32>
    %251 = math.exp %250 : vector<8x128xf32>
    %cst_70 = arith.constant 1.000000e+00 : f32
    %252 = vector.broadcast %cst_70 : f32 to vector<8x128xf32>
    %253 = arith.addf %252, %251 : vector<8x128xf32>
    %254 = arith.divf %252, %253 : vector<8x128xf32>
    %255 = vector.extract_strided_slice %242 {offsets = [0, 256], sizes = [8, 128], strides = [1, 1]} : vector<8x512xf32> to vector<8x128xf32>
    %256 = math.tanh %255 : vector<8x128xf32>
    %257 = vector.extract_strided_slice %242 {offsets = [0, 384], sizes = [8, 128], strides = [1, 1]} : vector<8x512xf32> to vector<8x128xf32>
    %258 = arith.negf %257 : vector<8x128xf32>
    %259 = math.exp %258 : vector<8x128xf32>
    %cst_71 = arith.constant 1.000000e+00 : f32
    %260 = vector.broadcast %cst_71 : f32 to vector<8x128xf32>
    %261 = arith.addf %260, %259 : vector<8x128xf32>
    %262 = arith.divf %260, %261 : vector<8x128xf32>
    %263 = arith.mulf %254, %229 : vector<8x128xf32>
    %264 = arith.mulf %248, %256 : vector<8x128xf32>
    %265 = arith.addf %263, %264 : vector<8x128xf32>
    %266 = math.tanh %265 : vector<8x128xf32>
    %267 = arith.mulf %262, %266 : vector<8x128xf32>
    %268 = arith.index_cast %c6_i32 : i32 to index
    %c0_72 = arith.constant 0 : index
    %c0_73 = arith.constant 0 : index
    %269 = vector.load %arg8[%268, %c0_72, %c0_73] : memref<8x8x128xf32, #tpu.memory_space<vmem>>, vector<1x8x128xf32>
    %270 = vector.shape_cast %269 : vector<1x8x128xf32> to vector<8x128xf32>
    %271 = vector.shape_cast %267 : vector<8x128xf32> to vector<1x8x128xf32>
    tpu.vector_store %arg8[%268, %c0_72, %c0_73], %271 {strides = array<i32>} : memref<8x8x128xf32, #tpu.memory_space<vmem>>, vector<1x8x128xf32>,
    %c7_i32 = arith.constant 7 : i32
    %272 = arith.index_cast %c7_i32 : i32 to index
    %c0_74 = arith.constant 0 : index
    %c0_75 = arith.constant 0 : index
    %273 = vector.load %arg9[%272, %c0_74, %c0_75] : memref<8x8x512xbf16, #tpu.memory_space<vmem>>, vector<1x8x512xbf16>
    %274 = vector.shape_cast %273 : vector<1x8x512xbf16> to vector<8x512xbf16>
    %275 = arith.extf %274 : vector<8x512xbf16> to vector<8x512xf32>
    %276 = arith.truncf %267 : vector<8x128xf32> to vector<8x128xbf16>
    %cst_76 = arith.constant dense<0.000000e+00> : vector<8x512xf32>
    %277 = tpu.matmul %276, %17, %cst_76 {dimension_numbers = #tpu.dot_dimension_numbers<[1], [0], [0], [1], [0, 0, 1, 1], [], []>} : vector<8x128xbf16>, vector<128x512xbf16>, vector<8x512xf32> -> vector<8x512xf32>
    %278 = arith.addf %275, %277 : vector<8x512xf32>
    %279 = vector.extract_strided_slice %278 {offsets = [0, 0], sizes = [8, 128], strides = [1, 1]} : vector<8x512xf32> to vector<8x128xf32>
    %280 = arith.negf %279 : vector<8x128xf32>
    %281 = math.exp %280 : vector<8x128xf32>
    %cst_77 = arith.constant 1.000000e+00 : f32
    %282 = vector.broadcast %cst_77 : f32 to vector<8x128xf32>
    %283 = arith.addf %282, %281 : vector<8x128xf32>
    %284 = arith.divf %282, %283 : vector<8x128xf32>
    %285 = vector.extract_strided_slice %278 {offsets = [0, 128], sizes = [8, 128], strides = [1, 1]} : vector<8x512xf32> to vector<8x128xf32>
    %286 = arith.negf %285 : vector<8x128xf32>
    %287 = math.exp %286 : vector<8x128xf32>
    %cst_78 = arith.constant 1.000000e+00 : f32
    %288 = vector.broadcast %cst_78 : f32 to vector<8x128xf32>
    %289 = arith.addf %288, %287 : vector<8x128xf32>
    %290 = arith.divf %288, %289 : vector<8x128xf32>
    %291 = vector.extract_strided_slice %278 {offsets = [0, 256], sizes = [8, 128], strides = [1, 1]} : vector<8x512xf32> to vector<8x128xf32>
    %292 = math.tanh %291 : vector<8x128xf32>
    %293 = vector.extract_strided_slice %278 {offsets = [0, 384], sizes = [8, 128], strides = [1, 1]} : vector<8x512xf32> to vector<8x128xf32>
    %294 = arith.negf %293 : vector<8x128xf32>
    %295 = math.exp %294 : vector<8x128xf32>
    %cst_79 = arith.constant 1.000000e+00 : f32
    %296 = vector.broadcast %cst_79 : f32 to vector<8x128xf32>
    %297 = arith.addf %296, %295 : vector<8x128xf32>
    %298 = arith.divf %296, %297 : vector<8x128xf32>
    %299 = arith.mulf %290, %265 : vector<8x128xf32>
    %300 = arith.mulf %284, %292 : vector<8x128xf32>
    %301 = arith.addf %299, %300 : vector<8x128xf32>
    %302 = math.tanh %301 : vector<8x128xf32>
    %303 = arith.mulf %298, %302 : vector<8x128xf32>
    %304 = arith.index_cast %c7_i32 : i32 to index
    %c0_80 = arith.constant 0 : index
    %c0_81 = arith.constant 0 : index
    %305 = vector.load %arg8[%304, %c0_80, %c0_81] : memref<8x8x128xf32, #tpu.memory_space<vmem>>, vector<1x8x128xf32>
    %306 = vector.shape_cast %305 : vector<1x8x128xf32> to vector<8x128xf32>
    %307 = vector.shape_cast %303 : vector<8x128xf32> to vector<1x8x128xf32>
    tpu.vector_store %arg8[%304, %c0_80, %c0_81], %307 {strides = array<i32>} : memref<8x8x128xf32, #tpu.memory_space<vmem>>, vector<1x8x128xf32>,
    %c8_i32 = arith.constant 8 : i32
    %c3_i32_82 = arith.constant 3 : i32
    %308 = arith.cmpi eq, %arg0, %c3_i32_82 : i32
    %309 = arith.extui %308 : i1 to i32
    %c0_i32_83 = arith.constant 0 : i32
    %310 = arith.cmpi ne, %309, %c0_i32_83 : i32
    scf.if %310 {
      %c4 = arith.constant 4 : index
      %c0_84 = arith.constant 0 : index
      %c0_85 = arith.constant 0 : index
      %311 = vector.load %arg8[%c4, %c0_84, %c0_85] : memref<8x8x128xf32, #tpu.memory_space<vmem>>, vector<4x8x128xf32>
      %c0_86 = arith.constant 0 : index
      %c0_87 = arith.constant 0 : index
      %312 = vector.load %arg5[%c0_86, %c0_87] : memref<1x128xf32, #tpu.memory_space<vmem>>, vector<1x128xf32>
      %c0_88 = arith.constant 0 : index
      %c0_89 = arith.constant 0 : index
      %313 = vector.load %arg6[%c0_88, %c0_89] : memref<1x1xf32, #tpu.memory_space<vmem>>, vector<1x1xf32>
      %314 = vector.shape_cast %312 : vector<1x128xf32> to vector<1x1x128xf32>
      %315 = vector.broadcast %314 : vector<1x1x128xf32> to vector<4x8x128xf32>
      %316 = arith.mulf %311, %315 : vector<4x8x128xf32>
      %cst_90 = arith.constant dense<0.000000e+00> : vector<4x8xf32>
      %317 = vector.multi_reduction <add>, %316, %cst_90 [2] : vector<4x8x128xf32> to vector<4x8xf32>
      %318 = vector.shape_cast %317 : vector<4x8xf32> to vector<4x8x1xf32>
      %319 = vector.shape_cast %313 : vector<1x1xf32> to vector<1x1x1xf32>
      %320 = vector.broadcast %319 : vector<1x1x1xf32> to vector<4x8x1xf32>
      %321 = arith.addf %318, %320 : vector<4x8x1xf32>
      %c0_91 = arith.constant 0 : index
      %c0_92 = arith.constant 0 : index
      %c0_93 = arith.constant 0 : index
      %322 = vector.load %arg7[%c0_91, %c0_92, %c0_93] : memref<4x8x1xf32, #tpu.memory_space<vmem>>, vector<4x8x1xf32>
      tpu.vector_store %arg7[%c0_91, %c0_92, %c0_93], %321 {strides = array<i32>} : memref<4x8x1xf32, #tpu.memory_space<vmem>>, vector<4x8x1xf32>,
    } else {
    }
    return
  }
  func.func @transform_1(%arg0: i32) -> (i32, i32, i32) {
    %c0_i32 = arith.constant 0 : i32
    %c0_i32_0 = arith.constant 0 : i32
    %c0_i32_1 = arith.constant 0 : i32
    return %arg0, %c0_i32, %c0_i32_0 : i32, i32, i32
  }
  func.func @transform_2(%arg0: i32) -> (i32, i32, i32) {
    %c0_i32 = arith.constant 0 : i32
    %c0_i32_0 = arith.constant 0 : i32
    %c0_i32_1 = arith.constant 0 : i32
    return %arg0, %c0_i32, %c0_i32_0 : i32, i32, i32
  }
  func.func @transform_3(%arg0: i32) -> (i32, i32, i32) {
    %c0_i32 = arith.constant 0 : i32
    %c0_i32_0 = arith.constant 0 : i32
    %c0_i32_1 = arith.constant 0 : i32
    return %arg0, %c0_i32, %c0_i32_0 : i32, i32, i32
  }
  func.func @transform_4(%arg0: i32) -> (i32, i32) {
    %c0_i32 = arith.constant 0 : i32
    %c0_i32_0 = arith.constant 0 : i32
    %c0_i32_1 = arith.constant 0 : i32
    return %c0_i32, %c0_i32_0 : i32, i32
  }
  func.func @transform_5(%arg0: i32) -> (i32, i32) {
    %c0_i32 = arith.constant 0 : i32
    %c0_i32_0 = arith.constant 0 : i32
    %c0_i32_1 = arith.constant 0 : i32
    return %c0_i32, %c0_i32_0 : i32, i32
  }
  func.func @transform_6(%arg0: i32) -> (i32, i32, i32) {
    %c0_i32 = arith.constant 0 : i32
    %c0_i32_0 = arith.constant 0 : i32
    %c0_i32_1 = arith.constant 0 : i32
    %c0_i32_2 = arith.constant 0 : i32
    return %c0_i32, %c0_i32_0, %c0_i32_1 : i32, i32, i32
  }
}

</mosaic_0001>

<bundles_post_ra>
// kernel: lstm_time_series_forward.1
= control target key start
LH: loop header
LB: loop body
LE: loop exit
PB: predicated region body
PF: predicated region fallthrough
CT: control target
= control target key end

     0   :  { %s3591_s0 = inlined_call_operand.vmem [shape: f32[8,8,128], index: 0, kind: input, shape index: {}]   ;;  %s3592_s1 = inlined_call_operand.hbm [shape: bf16[4,128,512], index: 1, kind: input, shape index: {}]   ;;  %s3593_s2 = inlined_call_operand.hbm [shape: bf16[4,128,512], index: 2, kind: input, shape index: {}]   ;;  %s3594_s3 = inlined_call_operand.vmem [shape: f32[4,1,512], index: 3, kind: input, shape index: {}]   ;;  %s3595_s4 = inlined_call_operand.vmem [shape: f32[1,128], index: 4, kind: input, shape index: {}]   ;;  %s3596_s5 = inlined_call_operand.<no memory space> [shape: f32[1,1], index: 5, kind: input, shape index: {}]   ;;  %s3597_s6 = inlined_call_operand.vmem [shape: f32[4,8,1], index: 6, kind: output, shape index: {}]  }
   0x1   :  { %v11_v0 = vstv %s3596_s5 }
   0x2   :  { %12 = vst [vmem:[#allocation5] sm:$0x1] %v11_v0 }
   0x3   :  { %13 = vsyncpa [#allocation7], 0 }
   0x4   :  { %15 = vsyncpa [#allocation7 + $0x1], 0 }
   0x5   :  { %16 = vsyncpa [#allocation9], 0 }
   0x6   :  { %18 = vsyncpa [#allocation9 + $0x1], 0  ;;  %s2741_s23 = smov 0   ;;  %s2743_s24 = smov 0  }
   0x7   :  { %s2745_s25 = smov 0   ;;  %s2747_s26 = smov 0  }
   0x8 LB: > { %s2760_s5 = sadd.s32 4294967295, %s2696_s26   ;;  %s2763_s27 = sadd.s32 1, %s2696_s26   ;;  %s2696_s26 = sphi %s2747_s26, %s3625_s26   ;;  %s2692_s25 = sphi %s2745_s25, %s3624_s25   ;;  %s2688_s24 = sphi %s2743_s24, %s3623_s24   ;;  %s2684_s23 = sphi %s2741_s23, %s3622_s23  }
   0x9   : > { %s28_s28 = ssub.s32 %s2696_s26, %s2763_s27  ;;  %s31_s29 = sadd.s32 1, %s2692_s25 }
   0xa   : > { %p29_p0 = scmp.eq.s32.totalorder %s28_s28, 0  ;;  %p38_p1 = scmp.ne.s32.totalorder %s2692_s25, %s2688_s24 }
   0xb   : > { %p39_p2 = scmp.eq.s32.totalorder %s2696_s26, 0  ;;  %p44_p3 = scmp.ne.s32.totalorder %s2688_s24, %s2684_s23 }
   0xc   : > { %s2773_s30 = scalar_select %p29_p0, %s2692_s25, %s31_s29  }
   0xd   : > { %p40_p4 = por %p39_p2, %p38_p1  ;;  %p45_p5 = scmp.eq.s32.totalorder %s2760_s5, 0 }
   0xe   : > { %p2304_p6 = scmp.lt.s32.totalorder %s2696_s26, 4  ;;  %s2782_s8 = sand.u32 1, %s2692_s25  }
   0xf   : > { %p2777_p7 = por %p45_p5, %p44_p3  ;;  %s2154_s9 = sshll.u32 %s2782_s8, 8 }
  0x10   : > { %s2275_s10 = sshll.u32 %s2696_s26, 12  ;;  %s193_s14 = scalar_lea.vmem [#allocation6], %s2154_s9 }
  0x11   : > { %s3606_s7 = scalar_select %p2777_p7, 1, 0 }
  0x12   : > { %s2791_s13 = scalar_lea.hbm %s3592_s1, %s2275_s10  ;;  %s200_s15 = sshll.u32 %s193_s14, 4  ;;  %s2795_s15 = int_to_ptr.vmem [resolvable:$true] %s200_s15 }
  0x13   : > { %p2797_p8 = pnand %p2304_p6, %p40_p4  ;;  %s190_s17 = scalar_lea.sflag [#allocation7], %s2782_s8 }
  0x14   : > { %s2596_s18 = scalar_lea.hbm %s2791_s13, 4096  ;;  %s2601_s21 = scalar_lea.hbm %s3592_s1, 16384 }
  0x15   : > { %p2597_p10 = scmp.ne.s32.totalorder %s2791_s13, %s2596_s18  ;;  %p2598_p11 = pneg %p2797_p8 }
  0x16   : > { %p2602_p0 = scmp.lt.u32.totalorder %s2791_s13, %s3592_s1  ;;  %p2603_p1 = scmp.lt.u32.totalorder %s2601_s21, %s2596_s18 }
  0x17   : > { %p2599_p12 = pnand %p2598_p11, %p2597_p10  ;;  %p2605_p3 = scmp.lt.u32.totalorder %s2596_s18, %s2791_s13 }
  0x18   : > { %p2604_p2 = por %p2603_p1, %p2602_p0 }
  0x19   : > { %p2600_p13 = pneg %p2599_p12 }
  0x1a   : > { %p2606_p4 = por %p2605_p3, %p2604_p2 }
  0x1c   : > { %p2607_p5 = pnand %p2606_p4, %p2600_p13 }
  0x1e   : > { %2610 = shalt.err (!%p2607_p5)
}
  0x1f   : > { %s2611_s28 = scalar_lea.vmem %s2795_s15, 4096  ;;  %s2698_s29 = smov [#allocation6]  }
  0x20   : > { %p2612_p6 = scmp.ne.s32.totalorder %s2795_s15, %s2611_s28  ;;  %s2616_s11 = sshll.u32 %s2698_s29, 4  ;;  %s2617_s11 = int_to_ptr.vmem [resolvable:$false] %s2616_s11 }
  0x21   : > { %s2618_s12 = scalar_lea.vmem %s2617_s11, 8192  ;;  %p2619_p9 = scmp.lt.s32.totalorder %s2795_s15, %s2617_s11 }
  0x22   : > { %p2614_p10 = pnand %p2612_p6, %p2598_p11  ;;  %p2620_p0 = scmp.lt.s32.totalorder %s2618_s12, %s2611_s28 }
  0x24   : > { %p2615_p12 = pneg %p2614_p10  ;;  %p2621_p1 = por %p2620_p0, %p2619_p9 }
  0x26   : > { %p2622_p2 = pnand %p2621_p1, %p2615_p12 }
  0x28   : > { %2625 = shalt.err (!%p2622_p2)
}
  0x29   : > { %s2699_s14 = smov 256   ;;  %s2700_s18 = smov 16  }
  0x2a   : > { %2300 = dma.hbm_to_vmem [thread:$0]  (!%p2797_p8), %s2791_s13, 4096, %s2795_s15, %s190_s17, %s2699_s14, %s2699_s14, %s2700_s18  }
  0x2b   : > { %p236_p9 = scmp.lt.s32.totalorder %s2696_s26, 5  ;;  %s2839_s21 = scalar_lea.hbm %s3593_s2, %s2275_s10 }
  0x2c   : > { %p3608_p13 = scmp.ge.s32.totalorder %s2696_s26, 1  ;;  %s214_s23 = scalar_lea.vmem [#allocation8], %s2154_s9 }
  0x2d   : > { %s221_s28 = sshll.u32 %s214_s23, 4  ;;  %s211_s13 = scalar_lea.sflag [#allocation9], %s2782_s8  ;;  %s2849_s28 = int_to_ptr.vmem [resolvable:$true] %s221_s28 }
  0x2e   : > { %p2843_p3 = pnand %p3608_p13, %p236_p9  ;;  %s2626_s15 = scalar_lea.hbm %s2839_s21, 4096 }
  0x2f   : > { %p2627_p4 = scmp.ne.s32.totalorder %s2839_s21, %s2626_s15  ;;  %s2631_s17 = scalar_lea.hbm %s3593_s2, 16384 }
  0x30   : > { %p2632_p10 = scmp.lt.u32.totalorder %s2839_s21, %s3593_s2  ;;  %p2633_p12 = scmp.lt.u32.totalorder %s2631_s17, %s2626_s15 }
  0x31   : > { %p2629_p5 = pnand %p2627_p4, %p2598_p11  ;;  %p2635_p1 = scmp.lt.u32.totalorder %s2626_s15, %s2839_s21 }
  0x32   : > { %p2634_p0 = por %p2633_p12, %p2632_p10 }
  0x33   : > { %p2630_p6 = pneg %p2629_p5 }
  0x34   : > { %p2636_p2 = por %p2635_p1, %p2634_p0 }
  0x36   : > { %p2637_p9 = pnand %p2636_p2, %p2630_p6 }
  0x38   : > { %2640 = shalt.err (!%p2637_p9)
}
  0x39   : > { %s2641_s9 = scalar_lea.vmem %s2849_s28, 4096  ;;  %s2701_s12 = smov [#allocation8]  }
  0x3a   : > { %p2642_p13 = scmp.ne.s32.totalorder %s2849_s28, %s2641_s9  ;;  %s2646_s19 = sshll.u32 %s2701_s12, 4  ;;  %s2647_s19 = int_to_ptr.vmem [resolvable:$false] %s2646_s19 }
  0x3b   : > { %s2648_s20 = scalar_lea.vmem %s2647_s19, 8192  ;;  %p2649_p7 = scmp.lt.s32.totalorder %s2849_s28, %s2647_s19 }
  0x3c   : > { %p2644_p4 = pnand %p2642_p13, %p2598_p11  ;;  %p2650_p10 = scmp.lt.s32.totalorder %s2648_s20, %s2641_s9 }
  0x3e   : > { %p2645_p5 = pneg %p2644_p4  ;;  %p2651_p12 = por %p2650_p10, %p2649_p7 }
  0x40   : > { %p2652_p0 = pnand %p2651_p12, %p2645_p5 }
  0x42   : > { %2655 = shalt.err (!%p2652_p0)
}
  0x43   : > { %2303 = dma.hbm_to_vmem [thread:$0]  (!%p2797_p8), %s2839_s21, 4096, %s2849_s28, %s211_s13, %s2699_s14, %s2699_s14, %s2700_s18  }
  0x44   : > { %240 = sbr.rel (%p2843_p3) target bundleno = 2393 (0x959), region = 40 }
  0x4b   : > { %s242_s23 = sand.u32 1, %s2688_s24   ;;  %p3610_p7 = scmp.ne.s32.totalorder %s3606_s7, 0 }
  0x4c   : > { %s2161_s15 = sshll.u32 %s242_s23, 8  ;;  %s243_s26 = scalar_lea.sflag [#allocation7], %s242_s23 }
  0x4d   : > { %s2883_s10 = scalar_lea.vmem [#allocation6], %s2161_s15 }
  0x4e   : > { %2673 = dma.done.wait (%p3610_p7), %s243_s26, 4096  }
  0x4f   : > { %2675 = vsyncadd (%p3610_p7), %s243_s26, 4294963200  ;;  %s252_s8 = scalar_lea.sflag [#allocation9], %s242_s23  ;;  %s2889_s16 = scalar_lea.vmem [#allocation8], %s2161_s15 }
  0x50   : > { %2677 = dma.done.wait (%p3610_p7), %s252_s8, 4096  }
  0x51   : > { %2679 = vsyncadd (%p3610_p7), %s252_s8, 4294963200  ;;  %p286_p8 = scmp.lt.s32.totalorder %s2760_s5, 3  ;;  %p2164_p11 = scmp.ne.s32.totalorder %s2760_s5, 0 }
  0x52   : > { %v327_v1 = vld [vmem:[%s3591_s0] sm:$0xff] (!%p2164_p11)  ;;  %v329_v2 = vld [vmem:[%s3591_s0 + $0x8] sm:$0xff] (!%p2164_p11)  ;;  %v331_v3 = vld [vmem:[%s3591_s0 + $0x10] sm:$0xff] (!%p2164_p11) }
  0x53   : > { %s287_s14 = scalar_select %p286_p8, %s2760_s5, 3 }
  0x54   : > { %294 = sbr.rel (%p2164_p11) target bundleno = 94 (0x5e), region = 52  ;;  %328 = vst [vmem:[#allocation2] sm:$0xff] (!%p2164_p11), %v327_v1  ;;  %330 = vst [vmem:[#allocation2 + $0x8] sm:$0xff] (!%p2164_p11), %v329_v2  ;;  %v333_v4 = vld [vmem:[%s3591_s0 + $0x18] sm:$0xff] (!%p2164_p11)  ;;  %v335_v5 = vld [vmem:[%s3591_s0 + $0x20] sm:$0xff] (!%p2164_p11) }
  0x55   : > { %s2163_s18 = sshll.u32 %s287_s14, 2  ;;  %332 = vst [vmem:[#allocation2 + $0x10] sm:$0xff] (!%p2164_p11), %v331_v3  ;;  %v337_v6 = vld [vmem:[%s3591_s0 + $0x28] sm:$0xff] (!%p2164_p11)  ;;  %334 = vst [vmem:[#allocation2 + $0x18] sm:$0xff] (!%p2164_p11), %v333_v4  ;;  %v339_v7 = vld [vmem:[%s3591_s0 + $0x30] sm:$0xff] (!%p2164_p11) }
  0x56   : > { %s2900_s28 = scalar_lea.vmem %s3594_s3, %s2163_s18  ;;  %336 = vst [vmem:[#allocation2 + $0x20] sm:$0xff] (!%p2164_p11), %v335_v5  ;;  %338 = vst [vmem:[#allocation2 + $0x28] sm:$0xff] (!%p2164_p11), %v337_v6  ;;  %v341_v8 = vld [vmem:[%s3591_s0 + $0x38] sm:$0xff] (!%p2164_p11) }
  0x57   : > { %340 = vst [vmem:[#allocation2 + $0x30] sm:$0xff] (!%p2164_p11), %v339_v7  ;;  %342 = vst [vmem:[#allocation2 + $0x38] sm:$0xff] (!%p2164_p11), %v341_v8 }
  0x5b   : > { %350 = vsyncadd [#allocation4], 1024 }
  0x5c   : > { %2680 = dma.done.wait [#allocation4], 1024 }
  0x5d   : > { %2681 = vsyncadd [#allocation4], 4294966272 }
  0x5e PF: > { %v2340_v9 = vld [vmem:[%s2883_s10 + $0x4] ss:$16 sps:$4 sm:$0xff]   ;;  %v2342_v10 = vld [vmem:[%s2883_s10 + $0xc] ss:$16 sps:$4 sm:$0xff]   ;;  %v3599_v11 = vmov 0   ;;  %p2269_p3 = scmp.ne.s32.totalorder %s2760_s5, 3 }
  0x5f   : > { %613 = vmatprep.mubr.bf16.mxu0 %v3599_v11  ;;  %686 = vmatprep.mubr.bf16.mxu1 %v3599_v11  ;;  %v2344_v12 = vld [vmem:[%s2883_s10] ss:$16 sps:$4 sm:$0xff]   ;;  %v2345_v13 = vld [vmem:[%s2883_s10 + $0x8] ss:$16 sps:$4 sm:$0xff]   ;;  %v2346_v14 = vld [vmem:[%s2883_s10 + $0x24] ss:$16 sps:$4 sm:$0xff]  }
  0x60   : > { %581 = vmatprep.subr.bf16.mxu0 %v2340_v9  ;;  %654 = vmatprep.subr.bf16.mxu1 %v2342_v10  ;;  %v2348_v15 = vld [vmem:[%s2883_s10 + $0x2c] ss:$16 sps:$4 sm:$0xff]   ;;  %v2350_v16 = vld [vmem:[%s2883_s10 + $0x20] ss:$16 sps:$4 sm:$0xff]   ;;  %v2351_v17 = vld [vmem:[%s2883_s10 + $0x28] ss:$16 sps:$4 sm:$0xff]  }
  0x61   : > { %582 = vmatpush1.bf16.msra.mxu0 %v2344_v12  ;;  %655 = vmatpush1.bf16.msra.mxu1 %v2345_v13  ;;  %v2352_v18 = vld [vmem:[%s2883_s10 + $0x44] ss:$16 sps:$4 sm:$0xff]   ;;  %v2354_v19 = vld [vmem:[%s2883_s10 + $0x4c] ss:$16 sps:$4 sm:$0xff]   ;;  %v2356_v20 = vld [vmem:[%s2883_s10 + $0x40] ss:$16 sps:$4 sm:$0xff]  }
  0x62   : > { %583 = vmatprep.subr.bf16.mxu0 %v2346_v14  ;;  %656 = vmatprep.subr.bf16.mxu1 %v2348_v15  ;;  %v2357_v21 = vld [vmem:[%s2883_s10 + $0x48] ss:$16 sps:$4 sm:$0xff]   ;;  %v2358_v22 = vld [vmem:[%s2883_s10 + $0x64] ss:$16 sps:$4 sm:$0xff]   ;;  %v2360_v23 = vld [vmem:[%s2883_s10 + $0x6c] ss:$16 sps:$4 sm:$0xff]  }
  0x63   : > { %v2362_v24 = vld [vmem:[%s2883_s10 + $0x60] ss:$16 sps:$4 sm:$0xff]   ;;  %v2363_v25 = vld [vmem:[%s2883_s10 + $0x68] ss:$16 sps:$4 sm:$0xff]   ;;  %v2364_v26 = vld [vmem:[%s2883_s10 + $0x84] ss:$16 sps:$4 sm:$0xff]  }
  0x64   : > { %v2366_v27 = vld [vmem:[%s2883_s10 + $0x8c] ss:$16 sps:$4 sm:$0xff]   ;;  %v2368_v28 = vld [vmem:[%s2883_s10 + $0x80] ss:$16 sps:$4 sm:$0xff]   ;;  %v2369_v29 = vld [vmem:[%s2883_s10 + $0x88] ss:$16 sps:$4 sm:$0xff]  }
  0x65   : > { %584 = vmatpush1.bf16.msra.mxu0 %v2350_v16  ;;  %657 = vmatpush1.bf16.msra.mxu1 %v2351_v17  ;;  %v2370_v30 = vld [vmem:[%s2883_s10 + $0xa4] ss:$16 sps:$4 sm:$0xff]   ;;  %v2372_v31 = vld [vmem:[%s2883_s10 + $0xac] ss:$16 sps:$4 sm:$0xff]   ;;  %v2374_v32 = vld [vmem:[%s2883_s10 + $0xa0] ss:$16 sps:$4 sm:$0xff]  }
  0x66   : > { %585 = vmatprep.subr.bf16.mxu0 %v2352_v18  ;;  %658 = vmatprep.subr.bf16.mxu1 %v2354_v19  ;;  %v2375_v33 = vld [vmem:[%s2883_s10 + $0xa8] ss:$16 sps:$4 sm:$0xff]   ;;  %v2376_v34 = vld [vmem:[%s2883_s10 + $0xc4] ss:$16 sps:$4 sm:$0xff]   ;;  %v2378_v35 = vld [vmem:[%s2883_s10 + $0xcc] ss:$16 sps:$4 sm:$0xff]  }
  0x67   : > { %v2380_v36 = vld [vmem:[%s2883_s10 + $0xc0] ss:$16 sps:$4 sm:$0xff]   ;;  %v2381_v37 = vld [vmem:[%s2883_s10 + $0xc8] ss:$16 sps:$4 sm:$0xff]   ;;  %v2382_v38 = vld [vmem:[%s2883_s10 + $0xe4] ss:$16 sps:$4 sm:$0xff]  }
  0x68   : > { %v2384_v39 = vld [vmem:[%s2883_s10 + $0xec] ss:$16 sps:$4 sm:$0xff]   ;;  %v2386_v40 = vld [vmem:[%s2883_s10 + $0xe0] ss:$16 sps:$4 sm:$0xff]   ;;  %v2387_v41 = vld [vmem:[%s2883_s10 + $0xe8] ss:$16 sps:$4 sm:$0xff]  }
  0x69   : > { %586 = vmatpush1.bf16.msra.mxu0 %v2356_v20  ;;  %659 = vmatpush1.bf16.msra.mxu1 %v2357_v21  ;;  %v355_v42 = vld [vmem:[#allocation2] sm:$0xff]  ;;  %v356_v43 = vld [vmem:[#allocation2 + $0x8] sm:$0xff]  ;;  %v357_v53 = vld [vmem:[#allocation2 + $0x10] sm:$0xff]  ;;  %vm2058_vm0 = vcmask (!%p2269_p3), 7168  }
  0x6a   : > { %587 = vmatprep.subr.bf16.mxu0 %v2358_v22  ;;  %660 = vmatprep.subr.bf16.mxu1 %v2360_v23  ;;  %v2962_v44 = vld [vmem:[%s2889_s16 + $0x4] ss:$16 sps:$4 sm:$0xff]   ;;  %v2965_v45 = vld [vmem:[%s2889_s16 + $0xc] ss:$16 sps:$4 sm:$0xff]   ;;  %v363_v46 = vpack.c.bf16 %v356_v43, %v355_v42  ;;  %v2968_v47 = vld [vmem:[%s2889_s16] ss:$16 sps:$4 sm:$0xff]   ;;  %v401_v23 = vlaneseq }
  0x6b   : > { %v2971_v48 = vld [vmem:[%s2889_s16 + $0x8] ss:$16 sps:$4 sm:$0xff]   ;;  %v2976_v49 = vld [vmem:[%s2889_s16 + $0x24] ss:$16 sps:$4 sm:$0xff]   ;;  %v2979_v50 = vld [vmem:[%s2889_s16 + $0x2c] ss:$16 sps:$4 sm:$0xff]  }
  0x6c   : > { %v2982_v51 = vld [vmem:[%s2889_s16 + $0x20] ss:$16 sps:$4 sm:$0xff]   ;;  %v2985_v52 = vld [vmem:[%s2889_s16 + $0x28] ss:$16 sps:$4 sm:$0xff]   ;;  %v2990_v55 = vld [vmem:[%s2889_s16 + $0x44] ss:$16 sps:$4 sm:$0xff]  }
  0x6d   : > { %588 = vmatpush1.bf16.msra.mxu0 %v2362_v24  ;;  %661 = vmatpush1.bf16.msra.mxu1 %v2363_v25  ;;  %v358_v54 = vld [vmem:[#allocation2 + $0x18] sm:$0xff]  ;;  %v3000_v58 = vld [vmem:[%s2889_s16 + $0x40] ss:$16 sps:$4 sm:$0xff]   ;;  %v360_v1 = vld [vmem:[#allocation2 + $0x28] sm:$0xff]  ;;  %v402_v24 = vshrl.u32 %v401_v23, 7 }
  0x6e   : > { %589 = vmatprep.subr.bf16.mxu0 %v2364_v26  ;;  %662 = vmatprep.subr.bf16.mxu1 %v2366_v27  ;;  %v2995_v56 = vld [vmem:[%s2889_s16 + $0x4c] ss:$16 sps:$4 sm:$0xff]   ;;  %v364_v57 = vpack.c.bf16 %v358_v54, %v357_v53  ;;  %v3003_v59 = vld [vmem:[%s2889_s16 + $0x48] ss:$16 sps:$4 sm:$0xff]   ;;  %v3008_v60 = vld [vmem:[%s2889_s16 + $0x64] ss:$16 sps:$4 sm:$0xff]  }
  0x6f   : > { %v3013_v61 = vld [vmem:[%s2889_s16 + $0x6c] ss:$16 sps:$4 sm:$0xff]   ;;  %v3016_v62 = vld [vmem:[%s2889_s16 + $0x60] ss:$16 sps:$4 sm:$0xff]   ;;  %v3019_v63 = vld [vmem:[%s2889_s16 + $0x68] ss:$16 sps:$4 sm:$0xff]  }
  0x70   : > { %v359_v0 = vld [vmem:[#allocation2 + $0x20] sm:$0xff]  ;;  %v3039_v6 = vld [vmem:[%s2889_s16 + $0x88] ss:$16 sps:$4 sm:$0xff]   ;;  %v361_v12 = vld [vmem:[#allocation2 + $0x30] sm:$0xff]  ;;  %v403_v25 = vsub.s32 0, %v402_v24  ;;  %v411_v26 = vsub.s32 2, %v402_v24 }
  0x71   : > { %590 = vmatpush1.bf16.msra.mxu0 %v2368_v28  ;;  %663 = vmatpush1.bf16.msra.mxu1 %v2369_v29  ;;  %v3026_v2 = vld [vmem:[%s2889_s16 + $0x84] ss:$16 sps:$4 sm:$0xff]   ;;  %v3029_v3 = vld [vmem:[%s2889_s16 + $0x8c] ss:$16 sps:$4 sm:$0xff]   ;;  %v365_v4 = vpack.c.bf16 %v360_v1, %v359_v0  ;;  %v3036_v5 = vld [vmem:[%s2889_s16 + $0x80] ss:$16 sps:$4 sm:$0xff]  }
  0x72   : > { %591 = vmatprep.subr.bf16.mxu0 %v2370_v30  ;;  %664 = vmatprep.subr.bf16.mxu1 %v2372_v31  ;;  %v3044_v7 = vld [vmem:[%s2889_s16 + $0xa4] ss:$16 sps:$4 sm:$0xff]   ;;  %v3047_v8 = vld [vmem:[%s2889_s16 + $0xac] ss:$16 sps:$4 sm:$0xff]   ;;  %v3050_v9 = vld [vmem:[%s2889_s16 + $0xa0] ss:$16 sps:$4 sm:$0xff]  }
  0x73   : > { %v3055_v10 = vld [vmem:[%s2889_s16 + $0xa8] ss:$16 sps:$4 sm:$0xff]   ;;  %v3060_v14 = vld [vmem:[%s2889_s16 + $0xc4] ss:$16 sps:$4 sm:$0xff]   ;;  %v3063_v15 = vld [vmem:[%s2889_s16 + $0xcc] ss:$16 sps:$4 sm:$0xff]  }
  0x74   : > { %v362_v13 = vld [vmem:[#allocation2 + $0x38] sm:$0xff]  ;;  %v3070_v17 = vld [vmem:[%s2889_s16 + $0xc0] ss:$16 sps:$4 sm:$0xff]   ;;  %v407_v28 = vsub.s32 1, %v402_v24  ;;  %v415_v29 = vsub.s32 3, %v402_v24 }
  0x75   : > { %592 = vmatpush1.bf16.msra.mxu0 %v2374_v32  ;;  %665 = vmatpush1.bf16.msra.mxu1 %v2375_v33  ;;  %v366_v16 = vpack.c.bf16 %v362_v13, %v361_v12  ;;  %v3073_v18 = vld [vmem:[%s2889_s16 + $0xc8] ss:$16 sps:$4 sm:$0xff]   ;;  %v3078_v19 = vld [vmem:[%s2889_s16 + $0xe4] ss:$16 sps:$4 sm:$0xff]   ;;  %v3081_v20 = vld [vmem:[%s2889_s16 + $0xec] ss:$16 sps:$4 sm:$0xff]  }
  0x76   : > { %593 = vmatprep.subr.bf16.mxu0 %v2376_v34  ;;  %666 = vmatprep.subr.bf16.mxu1 %v2378_v35  ;;  %v3086_v21 = vld [vmem:[%s2889_s16 + $0xe0] ss:$16 sps:$4 sm:$0xff]   ;;  %v3089_v22 = vld [vmem:[%s2889_s16 + $0xe8] ss:$16 sps:$4 sm:$0xff]  }
  0x77   : > { %v399_v27 = vld [vmem:[%s2900_s28] sm:$0xf] }
  0x78   : > { %v3136_v30 = vrot.slane %v399_v27, %v403_v25  ;;  %v3138_v31 = vrot.slane %v399_v27, %v411_v26  ;;  %v3140_v32 = vrot.slane %v399_v27, %v407_v28  ;;  %v3142_v33 = vrot.slane %v399_v27, %v415_v29 }
  0x79   : > { %594 = vmatpush1.bf16.msra.mxu0 %v2380_v36  ;;  %667 = vmatpush1.bf16.msra.mxu1 %v2381_v37 }
  0x7a   : > { %595 = vmatprep.subr.bf16.mxu0 %v2382_v38  ;;  %668 = vmatprep.subr.bf16.mxu1 %v2384_v39 }
  0x7d   : > { %596 = vmatpush1.bf16.msra.mxu0 %v2386_v40  ;;  %669 = vmatpush1.bf16.msra.mxu1 %v2387_v41 }
  0x7e   : > { %1069 = vmatprep.subr.bf16.mxu0 %v2962_v44  ;;  %1110 = vmatprep.subr.bf16.mxu1 %v2965_v45 }
  0x80   : > { %614 = vmatmul.mubr.bf16.vlgmr.msra.gmra.mrb[0].mxu0 %v363_v46  ;;  %687 = vmatmul.mubr.bf16.vlgmr.msra.gmra.mrb[0].mxu1 %v363_v46 }
  0x81   : > { %1070 = vmatpush1.bf16.msra.mxu0 %v2968_v47  ;;  %1111 = vmatpush1.bf16.msra.mxu1 %v2971_v48 }
  0x82   : > { %1071 = vmatprep.subr.bf16.mxu0 %v2976_v49  ;;  %1112 = vmatprep.subr.bf16.mxu1 %v2979_v50 }
  0x83   : > { %623 = vmatprep.mubr.bf16.mxu0 %v3599_v11  ;;  %696 = vmatprep.mubr.bf16.mxu1 %v3599_v11 }
  0x85   : > { %1072 = vmatpush1.bf16.msra.mxu0 %v2982_v51  ;;  %1113 = vmatpush1.bf16.msra.mxu1 %v2985_v52 }
  0x86   : > { %1073 = vmatprep.subr.bf16.mxu0 %v2990_v55  ;;  %1114 = vmatprep.subr.bf16.mxu1 %v2995_v56 }
  0x88   : > { %624 = vmatmul.mubr.bf16.gmra.mrb[4].mxu0 %v364_v57  ;;  %697 = vmatmul.mubr.bf16.gmra.mrb[4].mxu1 %v364_v57 }
  0x89   : > { %1074 = vmatpush1.bf16.msra.mxu0 %v3000_v58  ;;  %1115 = vmatpush1.bf16.msra.mxu1 %v3003_v59 }
  0x8a   : > { %1075 = vmatprep.subr.bf16.mxu0 %v3008_v60  ;;  %1116 = vmatprep.subr.bf16.mxu1 %v3013_v61 }
  0x8b   : > { %633 = vmatprep.mubr.bf16.mxu0 %v3599_v11  ;;  %706 = vmatprep.mubr.bf16.mxu1 %v3599_v11 }
  0x8d   : > { %1076 = vmatpush1.bf16.msra.mxu0 %v3016_v62  ;;  %1117 = vmatpush1.bf16.msra.mxu1 %v3019_v63 }
  0x8e   : > { %1077 = vmatprep.subr.bf16.mxu0 %v3026_v2  ;;  %1118 = vmatprep.subr.bf16.mxu1 %v3029_v3 }
  0x90   : > { %634 = vmatmul.mubr.bf16.gmra.mrb[8].mxu0 %v365_v4  ;;  %707 = vmatmul.mubr.bf16.gmra.mrb[8].mxu1 %v365_v4 }
  0x91   : > { %1078 = vmatpush1.bf16.msra.mxu0 %v3036_v5  ;;  %1119 = vmatpush1.bf16.msra.mxu1 %v3039_v6 }
  0x92   : > { %1079 = vmatprep.subr.bf16.mxu0 %v3044_v7  ;;  %1120 = vmatprep.subr.bf16.mxu1 %v3047_v8 }
  0x93   : > { %643 = vmatprep.mubr.bf16.mxu0 %v3599_v11  ;;  %716 = vmatprep.mubr.bf16.mxu1 %v3599_v11 }
  0x95   : > { %1080 = vmatpush1.bf16.msra.mxu0 %v3050_v9  ;;  %1121 = vmatpush1.bf16.msra.mxu1 %v3055_v10 }
  0x96   : > { %1081 = vmatprep.subr.bf16.mxu0 %v3060_v14  ;;  %1122 = vmatprep.subr.bf16.mxu1 %v3063_v15 }
  0x98   : > { %644 = vmatmul.mubr.bf16.gmra.mrb[12].mxu0 %v366_v16  ;;  %717 = vmatmul.mubr.bf16.gmra.mrb[12].mxu1 %v366_v16 }
  0x99   : > { %1082 = vmatpush1.bf16.msra.mxu0 %v3070_v17  ;;  %1123 = vmatpush1.bf16.msra.mxu1 %v3073_v18 }
  0x9a   : > { %1083 = vmatprep.subr.bf16.mxu0 %v3078_v19  ;;  %1124 = vmatprep.subr.bf16.mxu1 %v3081_v20 }
  0x9b   : > { %1101 = vmatprep.mubr.bf16.mxu0 %v3599_v11  ;;  %1142 = vmatprep.mubr.bf16.mxu1 %v3599_v11 }
  0x9d   : > { %1084 = vmatpush1.bf16.msra.mxu0 %v3086_v21  ;;  %1125 = vmatpush1.bf16.msra.mxu1 %v3089_v22 }
  0x9e   : > { %1188 = vmatprep.subr.bf16.mxu0 %v2962_v44  ;;  %1229 = vmatprep.subr.bf16.mxu1 %v2965_v45 }
  0xa0   : > { %1102 = vmatmul.mubr.bf16.vlgmr.msra.gmra.mrb[16].mxu0 %v3599_v11  ;;  %1143 = vmatmul.mubr.bf16.vlgmr.msra.gmra.mrb[16].mxu1 %v3599_v11 }
  0xa1   : > { %1189 = vmatpush1.bf16.msra.mxu0 %v2968_v47  ;;  %1230 = vmatpush1.bf16.msra.mxu1 %v2971_v48 }
  0xa2   : > { %1190 = vmatprep.subr.bf16.mxu0 %v2976_v49  ;;  %1231 = vmatprep.subr.bf16.mxu1 %v2979_v50 }
  0xa3   : > { %1220 = vmatprep.mubr.bf16.mxu0 %v3599_v11  ;;  %1261 = vmatprep.mubr.bf16.mxu1 %v3599_v11 }
  0xa5   : > { %1191 = vmatpush1.bf16.msra.mxu0 %v2982_v51  ;;  %1232 = vmatpush1.bf16.msra.mxu1 %v2985_v52 }
  0xa6   : > { %1192 = vmatprep.subr.bf16.mxu0 %v2990_v55  ;;  %1233 = vmatprep.subr.bf16.mxu1 %v2995_v56 }
  0xa9   : > { %1193 = vmatpush1.bf16.msra.mxu0 %v3000_v58  ;;  %1234 = vmatpush1.bf16.msra.mxu1 %v3003_v59 }
  0xaa   : > { %1194 = vmatprep.subr.bf16.mxu0 %v3008_v60  ;;  %1235 = vmatprep.subr.bf16.mxu1 %v3013_v61 }
  0xad   : > { %1195 = vmatpush1.bf16.msra.mxu0 %v3016_v62  ;;  %1236 = vmatpush1.bf16.msra.mxu1 %v3019_v63 }
  0xae   : > { %1196 = vmatprep.subr.bf16.mxu0 %v3026_v2  ;;  %1237 = vmatprep.subr.bf16.mxu1 %v3029_v3 }
  0xb1   : > { %1197 = vmatpush1.bf16.msra.mxu0 %v3036_v5  ;;  %1238 = vmatpush1.bf16.msra.mxu1 %v3039_v6 }
  0xb2   : > { %1198 = vmatprep.subr.bf16.mxu0 %v3044_v7  ;;  %1239 = vmatprep.subr.bf16.mxu1 %v3047_v8 }
  0xb5   : > { %1199 = vmatpush1.bf16.msra.mxu0 %v3050_v9  ;;  %1240 = vmatpush1.bf16.msra.mxu1 %v3055_v10 }
  0xb6   : > { %1200 = vmatprep.subr.bf16.mxu0 %v3060_v14  ;;  %1241 = vmatprep.subr.bf16.mxu1 %v3063_v15 }
  0xb9   : > { %1201 = vmatpush1.bf16.msra.mxu0 %v3070_v17  ;;  %1242 = vmatpush1.bf16.msra.mxu1 %v3073_v18 }
  0xba   : > { %1202 = vmatprep.subr.bf16.mxu0 %v3078_v19  ;;  %1243 = vmatprep.subr.bf16.mxu1 %v3081_v20 }
  0xbd   : > { %1203 = vmatpush1.bf16.msra.mxu0 %v3086_v21  ;;  %1244 = vmatpush1.bf16.msra.mxu1 %v3089_v22 }
  0xbe   : > { %1308 = vmatprep.subr.bf16.mxu0 %v2962_v44  ;;  %1349 = vmatprep.subr.bf16.mxu1 %v2965_v45 }
 0x153   : > { %v615_v34 = vpop.f32.mrb[0].mxu0  ;;  %v688_v35 = vpop.f32.mrb[0].mxu1 }
 0x154   : > { %v616_v36 = vadd.f32 %v615_v34, %v3136_v30  ;;  %v617_v37 = vpop.f32.mrb[1].mxu0  ;;  %v689_v38 = vadd.f32 %v688_v35, %v3138_v31  ;;  %v690_v39 = vpop.f32.mrb[1].mxu1 }
 0x155   : > { %v618_v40 = vadd.f32 %v617_v37, %v3140_v32  ;;  %v619_v41 = vpop.f32.mrb[2].mxu0  ;;  %v691_v42 = vadd.f32 %v690_v39, %v3142_v33  ;;  %v692_v43 = vpop.f32.mrb[2].mxu1 }
 0x156   : > { %v620_v46 = vadd.f32 %v619_v41, %v3136_v30  ;;  %v621_v53 = vpop.f32.mrb[3].mxu0  ;;  %v693_v54 = vadd.f32 %v692_v43, %v3138_v31  ;;  %v694_v57 = vpop.f32.mrb[3].mxu1 }
 0x157   : > { %v3150_v0 = vpack.c.bf16 %v618_v40, %v616_v36  ;;  %v622_v1 = vadd.f32 %v621_v53, %v3140_v32  ;;  %v3153_v4 = vpack.c.bf16 %v691_v42, %v689_v38  ;;  %v695_v12 = vadd.f32 %v694_v57, %v3142_v33 }
 0x159   : > { %v3156_v13 = vpack.c.bf16 %v622_v1, %v620_v46  ;;  %v3158_v16 = vpack.c.bf16 %v695_v12, %v693_v54 }
 0x15b   : > { %v625_v23 = vpop.f32.mrb[4].mxu0  ;;  %v698_v24 = vpop.f32.mrb[4].mxu1 }
 0x15c   : > { %v626_v25 = vadd.f32 %v625_v23, %v3136_v30  ;;  %v627_v26 = vpop.f32.mrb[5].mxu0  ;;  %v699_v27 = vadd.f32 %v698_v24, %v3138_v31  ;;  %v700_v28 = vpop.f32.mrb[5].mxu1 }
 0x15d   : > { %v628_v29 = vadd.f32 %v627_v26, %v3140_v32  ;;  %v629_v34 = vpop.f32.mrb[6].mxu0  ;;  %v701_v35 = vadd.f32 %v700_v28, %v3142_v33  ;;  %v702_v36 = vpop.f32.mrb[6].mxu1 }
 0x15e   : > { %v630_v37 = vadd.f32 %v629_v34, %v3136_v30  ;;  %v631_v38 = vpop.f32.mrb[7].mxu0  ;;  %v703_v39 = vadd.f32 %v702_v36, %v3138_v31  ;;  %v704_v40 = vpop.f32.mrb[7].mxu1 }
 0x15f   : > { %v3166_v41 = vpack.c.bf16 %v628_v29, %v626_v25  ;;  %v632_v42 = vadd.f32 %v631_v38, %v3140_v32  ;;  %v3169_v43 = vpack.c.bf16 %v701_v35, %v699_v27  ;;  %v705_v46 = vadd.f32 %v704_v40, %v3142_v33 }
 0x161   : > { %v3172_v53 = vpack.c.bf16 %v632_v42, %v630_v37  ;;  %v3174_v54 = vpack.c.bf16 %v705_v46, %v703_v39 }
 0x163   : > { %v635_v57 = vpop.f32.mrb[8].mxu0  ;;  %v708_v1 = vpop.f32.mrb[8].mxu1 }
 0x164   : > { %v636_v12 = vadd.f32 %v635_v57, %v3136_v30  ;;  %v637_v23 = vpop.f32.mrb[9].mxu0  ;;  %v709_v24 = vadd.f32 %v708_v1, %v3138_v31  ;;  %v710_v26 = vpop.f32.mrb[9].mxu1 }
 0x165   : > { %v638_v25 = vadd.f32 %v637_v23, %v3140_v32  ;;  %v639_v28 = vpop.f32.mrb[10].mxu0  ;;  %v711_v27 = vadd.f32 %v710_v26, %v3142_v33  ;;  %v712_v29 = vpop.f32.mrb[10].mxu1 }
 0x166   : > { %v640_v34 = vadd.f32 %v639_v28, %v3136_v30  ;;  %v641_v35 = vpop.f32.mrb[11].mxu0  ;;  %v713_v36 = vadd.f32 %v712_v29, %v3138_v31  ;;  %v714_v37 = vpop.f32.mrb[11].mxu1 }
 0x167   : > { %v3182_v38 = vpack.c.bf16 %v638_v25, %v636_v12  ;;  %v642_v39 = vadd.f32 %v641_v35, %v3140_v32  ;;  %v3185_v40 = vpack.c.bf16 %v711_v27, %v709_v24  ;;  %v715_v42 = vadd.f32 %v714_v37, %v3142_v33 }
 0x169   : > { %v3188_v46 = vpack.c.bf16 %v642_v39, %v640_v34  ;;  %v3190_v57 = vpack.c.bf16 %v715_v42, %v713_v36 }
 0x16b   : > { %3611 = vst [vmem:[#allocation14_spill] sm:$0xff] %v3188_v46  ;;  %3612 = vst [vmem:[#allocation15_spill] sm:$0xff] %v3190_v57  ;;  %v645_v1 = vpop.f32.mrb[12].mxu0  ;;  %v718_v23 = vpop.f32.mrb[12].mxu1 }
 0x16c   : > { %v646_v26 = vadd.f32 %v645_v1, %v3136_v30  ;;  %v647_v28 = vpop.f32.mrb[13].mxu0  ;;  %v719_v29 = vadd.f32 %v718_v23, %v3138_v31  ;;  %v720_v11 = vpop.f32.mrb[13].mxu1 }
 0x16d   : > { %v648_v12 = vadd.f32 %v647_v28, %v3140_v32  ;;  %v649_v25 = vpop.f32.mrb[14].mxu0  ;;  %v721_v24 = vadd.f32 %v720_v11, %v3142_v33  ;;  %v722_v27 = vpop.f32.mrb[14].mxu1  ;;  %v905_v11 = vunpack.c.l.bf16 %v3150_v0 }
 0x16e   : > { %v650_v35 = vadd.f32 %v649_v25, %v3136_v30  ;;  %v651_v34 = vpop.f32.mrb[15].mxu0  ;;  %v723_v36 = vadd.f32 %v722_v27, %v3138_v31  ;;  %v724_v37 = vpop.f32.mrb[15].mxu1  ;;  %v907_v30 = vunpack.c.l.bf16 %v3153_v4  ;;  %v906_v31 = vunpack.c.h.bf16 %v3150_v0 }
 0x16f   : > { %v3198_v39 = vpack.c.bf16 %v648_v12, %v646_v26  ;;  %v652_v42 = vadd.f32 %v651_v34, %v3140_v32  ;;  %v3201_v1 = vpack.c.bf16 %v721_v24, %v719_v29  ;;  %v725_v23 = vadd.f32 %v724_v37, %v3142_v33 }
 0x170   : > { %v908_v26 = vunpack.c.h.bf16 %v3153_v4 }
 0x171   : > { %3613 = vst [vmem:[#allocation16_spill] sm:$0xff] %v3201_v1  ;;  %v3204_v57 = vpack.c.bf16 %v652_v42, %v650_v35  ;;  %v3206_v28 = vpack.c.bf16 %v725_v23, %v723_v36 }
 0x173   : > { %3614 = vst [vmem:[#allocation17_spill] sm:$0xff] %v3204_v57  ;;  %3615 = vst [vmem:[#allocation18_spill] sm:$0xff] %v3206_v28  ;;  %v1103_v25 = vpop.f32.mrb[16].mxu0  ;;  %v1144_v46 = vpop.f32.mrb[16].mxu1 }
 0x174   : > { %v1151_v12 = vadd.f32 %v1103_v25, %v905_v11  ;;  %v1153_v32 = vadd.f32 %v1144_v46, %v907_v30  ;;  %v1105_v29 = vpop.f32.mrb[17].mxu0  ;;  %v1146_v24 = vpop.f32.mrb[17].mxu1 }
 0x175   : > { %v1152_v27 = vadd.f32 %v1105_v29, %v906_v31  ;;  %v1154_v33 = vadd.f32 %v1146_v24, %v908_v26  ;;  %v1107_v35 = vpop.f32.mrb[18].mxu0  ;;  %v1148_v34 = vpop.f32.mrb[18].mxu1 }
 0x176   : > { %v2245_v36 = vmul.f32 -1.442695, %v1151_v12  ;;  %v1108_v37 = vpop.f32.mrb[19].mxu0  ;;  %v1149_v42 = vpop.f32.mrb[19].mxu1 }
 0x177   : > { %v2246_v23 = vmul.f32 -1.442695, %v1152_v27  ;;  %v2247_v28 = vmul.f32 -1.442695, %v1154_v33  ;;  %v1185_v33 = vunpack.c.l.bf16 %v3158_v16  ;;  %v1186_v37 = vunpack.c.h.bf16 %v3158_v16 }
 0x178   : > { %2436 = vpow2.f32 %v2245_v36  ;;  %v1184_v36 = vunpack.c.h.bf16 %v3156_v13 }
 0x179   : > { %2438 = vpow2.f32 %v2246_v23 }
 0x17a   : > { %2440 = vpow2.f32 %v2247_v28 }
 0x17b   : > { %2442 = vtanh.f32 %v1153_v32  ;;  %v1183_v32 = vunpack.c.l.bf16 %v3156_v13 }
 0x182   : > { %v2437_v57 = vpop.eup %2436 }
 0x183   : > { %v2439_v1 = vpop.eup %2438  ;;  %v1158_v0 = vadd.f32 1.0, %v2437_v57 }
 0x184   : > { %v1164_v4 = vadd.f32 1.0, %v2439_v1  ;;  %v2441_v46 = vpop.eup %2440  ;;  %v3616_v1 = vmov 0  }
 0x185   : > { %2444 = vrcp.f32 %v1158_v0  ;;  %v2443_v11 = vpop.eup %2442  ;;  %v1171_v26 = vadd.f32 1.0, %v2441_v46 }
 0x186   : > { %2446 = vrcp.f32 %v1164_v4 }
 0x187   : > { %2448 = vrcp.f32 %v1171_v26 }
 0x18f   : > { %v2445_v30 = vpop.eup %2444 }
 0x190   : > { %v2447_v25 = vpop.eup %2446  ;;  %v1175_v31 = vmul.f32 %v2445_v30, %v2443_v11 }
 0x191   : > { %v1174_v12 = vmul.f32 0.0, %v2447_v25  ;;  %v2449_v24 = vpop.eup %2448 }
 0x193   : > { %v3212_v29 = vadd.f32 %v1175_v31, %v1174_v12 }
 0x195   : > { %2450 = vtanh.f32 %v3212_v29 }
 0x19f   : > { %v2451_v27 = vpop.eup %2450 }
 0x1a0   : > { %v1178_v57 = vmul.f32 %v2451_v27, %v2449_v24 }
 0x1a2   : > { %1179 = vst [vmem:[#allocation2] sm:$0xff] %v1178_v57  ;;  %v1187_v28 = vpack.c.bf16 %v1178_v57, %v1178_v57 }
 0x1a4   : > { %1221 = vmatmul.mubr.bf16.vlgmr.msra.gmra.mrb[20].mxu0 %v1187_v28  ;;  %1262 = vmatmul.mubr.bf16.vlgmr.msra.gmra.mrb[20].mxu1 %v1187_v28 }
 0x1a5   : > { %1309 = vmatpush1.bf16.msra.mxu0 %v2968_v47  ;;  %1350 = vmatpush1.bf16.msra.mxu1 %v2971_v48 }
 0x1a6   : > { %1310 = vmatprep.subr.bf16.mxu0 %v2976_v49  ;;  %1351 = vmatprep.subr.bf16.mxu1 %v2979_v50 }
 0x1a7   : > { %1340 = vmatprep.mubr.bf16.mxu0 %v3616_v1  ;;  %1381 = vmatprep.mubr.bf16.mxu1 %v3616_v1 }
 0x1a9   : > { %1311 = vmatpush1.bf16.msra.mxu0 %v2982_v51  ;;  %1352 = vmatpush1.bf16.msra.mxu1 %v2985_v52 }
 0x1aa   : > { %1312 = vmatprep.subr.bf16.mxu0 %v2990_v55  ;;  %1353 = vmatprep.subr.bf16.mxu1 %v2995_v56 }
 0x1ad   : > { %1313 = vmatpush1.bf16.msra.mxu0 %v3000_v58  ;;  %1354 = vmatpush1.bf16.msra.mxu1 %v3003_v59 }
 0x1ae   : > { %1314 = vmatprep.subr.bf16.mxu0 %v3008_v60  ;;  %1355 = vmatprep.subr.bf16.mxu1 %v3013_v61 }
 0x1b1   : > { %1315 = vmatpush1.bf16.msra.mxu0 %v3016_v62  ;;  %1356 = vmatpush1.bf16.msra.mxu1 %v3019_v63 }
 0x1b2   : > { %1316 = vmatprep.subr.bf16.mxu0 %v3026_v2  ;;  %1357 = vmatprep.subr.bf16.mxu1 %v3029_v3 }
 0x1b5   : > { %1317 = vmatpush1.bf16.msra.mxu0 %v3036_v5  ;;  %1358 = vmatpush1.bf16.msra.mxu1 %v3039_v6 }
 0x1b6   : > { %1318 = vmatprep.subr.bf16.mxu0 %v3044_v7  ;;  %1359 = vmatprep.subr.bf16.mxu1 %v3047_v8 }
 0x1b9   : > { %1319 = vmatpush1.bf16.msra.mxu0 %v3050_v9  ;;  %1360 = vmatpush1.bf16.msra.mxu1 %v3055_v10 }
 0x1ba   : > { %1320 = vmatprep.subr.bf16.mxu0 %v3060_v14  ;;  %1361 = vmatprep.subr.bf16.mxu1 %v3063_v15 }
 0x1bd   : > { %1321 = vmatpush1.bf16.msra.mxu0 %v3070_v17  ;;  %1362 = vmatpush1.bf16.msra.mxu1 %v3073_v18 }
 0x1be   : > { %1322 = vmatprep.subr.bf16.mxu0 %v3078_v19  ;;  %1363 = vmatprep.subr.bf16.mxu1 %v3081_v20 }
 0x1c1   : > { %1323 = vmatpush1.bf16.msra.mxu0 %v3086_v21  ;;  %1364 = vmatpush1.bf16.msra.mxu1 %v3089_v22 }
 0x1c2   : > { %1428 = vmatprep.subr.bf16.mxu0 %v2962_v44  ;;  %1469 = vmatprep.subr.bf16.mxu1 %v2965_v45 }
 0x277   : > { %v1222_v35 = vpop.f32.mrb[20].mxu0  ;;  %v1263_v34 = vpop.f32.mrb[20].mxu1 }
 0x278   : > { %v1270_v42 = vadd.f32 %v1222_v35, %v1183_v32  ;;  %v1272_v23 = vadd.f32 %v1263_v34, %v1185_v33  ;;  %v1224_v0 = vpop.f32.mrb[21].mxu0  ;;  %v1265_v4 = vpop.f32.mrb[21].mxu1 }
 0x279   : > { %v1271_v46 = vadd.f32 %v1224_v0, %v1184_v36  ;;  %v1273_v11 = vadd.f32 %v1265_v4, %v1186_v37  ;;  %v1226_v30 = vpop.f32.mrb[22].mxu0  ;;  %v1267_v25 = vpop.f32.mrb[22].mxu1 }
 0x27a   : > { %v2248_v31 = vmul.f32 -1.442695, %v1270_v42  ;;  %v1227_v26 = vpop.f32.mrb[23].mxu0  ;;  %v1268_v12 = vpop.f32.mrb[23].mxu1  ;;  %v1305_v30 = vunpack.c.l.bf16 %v3169_v43 }
 0x27b   : > { %v2249_v24 = vmul.f32 -1.442695, %v1271_v46  ;;  %v2250_v27 = vmul.f32 -1.442695, %v1273_v11  ;;  %v1304_v26 = vunpack.c.h.bf16 %v3166_v41  ;;  %v1306_v12 = vunpack.c.h.bf16 %v3169_v43 }
 0x27c   : > { %2452 = vpow2.f32 %v2248_v31 }
 0x27d   : > { %2454 = vpow2.f32 %v2249_v24 }
 0x27e   : > { %2456 = vpow2.f32 %v2250_v27 }
 0x27f   : > { %2458 = vtanh.f32 %v1272_v23 }
 0x286   : > { %v2453_v57 = vpop.eup %2452 }
 0x287   : > { %v2455_v28 = vpop.eup %2454  ;;  %v1277_v13 = vadd.f32 1.0, %v2453_v57 }
 0x288   : > { %v1283_v16 = vadd.f32 1.0, %v2455_v28  ;;  %v2457_v32 = vpop.eup %2456 }
 0x289   : > { %2460 = vrcp.f32 %v1277_v13  ;;  %v2459_v33 = vpop.eup %2458  ;;  %v1290_v37 = vadd.f32 1.0, %v2457_v32 }
 0x28a   : > { %2462 = vrcp.f32 %v1283_v16 }
 0x28b   : > { %2464 = vrcp.f32 %v1290_v37 }
 0x293   : > { %v2461_v35 = vpop.eup %2460 }
 0x294   : > { %v2463_v34 = vpop.eup %2462  ;;  %v1294_v36 = vmul.f32 %v2461_v35, %v2459_v33 }
 0x295   : > { %v1293_v42 = vmul.f32 %v2463_v34, %v3212_v29  ;;  %v2465_v4 = vpop.eup %2464  ;;  %v1303_v29 = vunpack.c.l.bf16 %v3166_v41 }
 0x297   : > { %v3254_v0 = vadd.f32 %v1294_v36, %v1293_v42 }
 0x299   : > { %2466 = vtanh.f32 %v3254_v0 }
 0x2a3   : > { %v2467_v46 = vpop.eup %2466 }
 0x2a4   : > { %v1297_v11 = vmul.f32 %v2467_v46, %v2465_v4 }
 0x2a6   : > { %1299 = vst [vmem:[#allocation2 + $0x8] sm:$0xff] %v1297_v11  ;;  %v1307_v23 = vpack.c.bf16 %v1297_v11, %v1297_v11 }
 0x2a8   : > { %1341 = vmatmul.mubr.bf16.vlgmr.msra.gmra.mrb[24].mxu0 %v1307_v23  ;;  %1382 = vmatmul.mubr.bf16.vlgmr.msra.gmra.mrb[24].mxu1 %v1307_v23 }
 0x2a9   : > { %1429 = vmatpush1.bf16.msra.mxu0 %v2968_v47  ;;  %1470 = vmatpush1.bf16.msra.mxu1 %v2971_v48 }
 0x2aa   : > { %1430 = vmatprep.subr.bf16.mxu0 %v2976_v49  ;;  %1471 = vmatprep.subr.bf16.mxu1 %v2979_v50 }
 0x2ab   : > { %1460 = vmatprep.mubr.bf16.mxu0 %v3616_v1  ;;  %1501 = vmatprep.mubr.bf16.mxu1 %v3616_v1 }
 0x2ad   : > { %1431 = vmatpush1.bf16.msra.mxu0 %v2982_v51  ;;  %1472 = vmatpush1.bf16.msra.mxu1 %v2985_v52 }
 0x2ae   : > { %1432 = vmatprep.subr.bf16.mxu0 %v2990_v55  ;;  %1473 = vmatprep.subr.bf16.mxu1 %v2995_v56 }
 0x2b1   : > { %1433 = vmatpush1.bf16.msra.mxu0 %v3000_v58  ;;  %1474 = vmatpush1.bf16.msra.mxu1 %v3003_v59 }
 0x2b2   : > { %1434 = vmatprep.subr.bf16.mxu0 %v3008_v60  ;;  %1475 = vmatprep.subr.bf16.mxu1 %v3013_v61 }
 0x2b5   : > { %1435 = vmatpush1.bf16.msra.mxu0 %v3016_v62  ;;  %1476 = vmatpush1.bf16.msra.mxu1 %v3019_v63 }
 0x2b6   : > { %1436 = vmatprep.subr.bf16.mxu0 %v3026_v2  ;;  %1477 = vmatprep.subr.bf16.mxu1 %v3029_v3 }
 0x2b9   : > { %1437 = vmatpush1.bf16.msra.mxu0 %v3036_v5  ;;  %1478 = vmatpush1.bf16.msra.mxu1 %v3039_v6 }
 0x2ba   : > { %1438 = vmatprep.subr.bf16.mxu0 %v3044_v7  ;;  %1479 = vmatprep.subr.bf16.mxu1 %v3047_v8 }
 0x2bd   : > { %1439 = vmatpush1.bf16.msra.mxu0 %v3050_v9  ;;  %1480 = vmatpush1.bf16.msra.mxu1 %v3055_v10 }
 0x2be   : > { %1440 = vmatprep.subr.bf16.mxu0 %v3060_v14  ;;  %1481 = vmatprep.subr.bf16.mxu1 %v3063_v15 }
 0x2c1   : > { %1441 = vmatpush1.bf16.msra.mxu0 %v3070_v17  ;;  %1482 = vmatpush1.bf16.msra.mxu1 %v3073_v18 }
 0x2c2   : > { %1442 = vmatprep.subr.bf16.mxu0 %v3078_v19  ;;  %1483 = vmatprep.subr.bf16.mxu1 %v3081_v20 }
 0x2c5   : > { %1443 = vmatpush1.bf16.msra.mxu0 %v3086_v21  ;;  %1484 = vmatpush1.bf16.msra.mxu1 %v3089_v22 }
 0x2c6   : > { %1548 = vmatprep.subr.bf16.mxu0 %v2962_v44  ;;  %1589 = vmatprep.subr.bf16.mxu1 %v2965_v45 }
 0x37b   : > { %v1342_v25 = vpop.f32.mrb[24].mxu0  ;;  %v1383_v31 = vpop.f32.mrb[24].mxu1 }
 0x37c   : > { %v1390_v24 = vadd.f32 %v1342_v25, %v1303_v29  ;;  %v1392_v27 = vadd.f32 %v1383_v31, %v1305_v30  ;;  %v1344_v57 = vpop.f32.mrb[25].mxu0  ;;  %v1385_v28 = vpop.f32.mrb[25].mxu1 }
 0x37d   : > { %v1391_v13 = vadd.f32 %v1344_v57, %v1304_v26  ;;  %v1393_v16 = vadd.f32 %v1385_v28, %v1306_v12  ;;  %v1346_v32 = vpop.f32.mrb[26].mxu0  ;;  %v1387_v33 = vpop.f32.mrb[26].mxu1 }
 0x37e   : > { %v2251_v35 = vmul.f32 -1.442695, %v1390_v24  ;;  %v1347_v34 = vpop.f32.mrb[27].mxu0  ;;  %v1388_v36 = vpop.f32.mrb[27].mxu1 }
 0x37f   : > { %v2252_v37 = vmul.f32 -1.442695, %v1391_v13  ;;  %v2253_v42 = vmul.f32 -1.442695, %v1393_v16 }
 0x380   : > { %2468 = vpow2.f32 %v2251_v35 }
 0x381   : > { %2470 = vpow2.f32 %v2252_v37 }
 0x382   : > { %2472 = vpow2.f32 %v2253_v42 }
 0x383   : > { %2474 = vtanh.f32 %v1392_v27 }
 0x38a   : > { %v2469_v4 = vpop.eup %2468 }
 0x38b   : > { %v2471_v46 = vpop.eup %2470  ;;  %v1397_v41 = vadd.f32 1.0, %v2469_v4 }
 0x38c   : > { %v1403_v43 = vadd.f32 1.0, %v2471_v46  ;;  %v2473_v11 = vpop.eup %2472 }
 0x38d   : > { %2476 = vrcp.f32 %v1397_v41  ;;  %v2475_v23 = vpop.eup %2474  ;;  %v1410_v31 = vadd.f32 1.0, %v2473_v11 }
 0x38e   : > { %2478 = vrcp.f32 %v1403_v43 }
 0x38f   : > { %2480 = vrcp.f32 %v1410_v31 }
 0x397   : > { %v2477_v29 = vpop.eup %2476 }
 0x398   : > { %v2479_v30 = vpop.eup %2478  ;;  %v1414_v25 = vmul.f32 %v2477_v29, %v2475_v23 }
 0x399   : > { %v1413_v26 = vmul.f32 %v2479_v30, %v3254_v0  ;;  %v2481_v24 = vpop.eup %2480 }
 0x39b   : > { %v3296_v12 = vadd.f32 %v1414_v25, %v1413_v26 }
 0x39d   : > { %2482 = vtanh.f32 %v3296_v12 }
 0x3a7   : > { %v2483_v57 = vpop.eup %2482 }
 0x3a8   : > { %v1417_v28 = vmul.f32 %v2483_v57, %v2481_v24 }
 0x3aa   : > { %1419 = vst [vmem:[#allocation2 + $0x10] sm:$0xff] %v1417_v28  ;;  %v1427_v27 = vpack.c.bf16 %v1417_v28, %v1417_v28 }
 0x3ac   : > { %1461 = vmatmul.mubr.bf16.vlgmr.msra.gmra.mrb[28].mxu0 %v1427_v27  ;;  %1502 = vmatmul.mubr.bf16.vlgmr.msra.gmra.mrb[28].mxu1 %v1427_v27 }
 0x3ad   : > { %1549 = vmatpush1.bf16.msra.mxu0 %v2968_v47  ;;  %1590 = vmatpush1.bf16.msra.mxu1 %v2971_v48  ;;  %v1423_v47 = vunpack.c.l.bf16 %v3172_v53  ;;  %v1425_v48 = vunpack.c.l.bf16 %v3174_v54 }
 0x3ae   : > { %1550 = vmatprep.subr.bf16.mxu0 %v2976_v49  ;;  %1591 = vmatprep.subr.bf16.mxu1 %v2979_v50 }
 0x3af   : > { %1580 = vmatprep.mubr.bf16.mxu0 %v3616_v1  ;;  %1621 = vmatprep.mubr.bf16.mxu1 %v3616_v1 }
 0x3b1   : > { %1551 = vmatpush1.bf16.msra.mxu0 %v2982_v51  ;;  %1592 = vmatpush1.bf16.msra.mxu1 %v2985_v52  ;;  %v1424_v51 = vunpack.c.h.bf16 %v3172_v53  ;;  %v1426_v52 = vunpack.c.h.bf16 %v3174_v54 }
 0x3b2   : > { %1552 = vmatprep.subr.bf16.mxu0 %v2990_v55  ;;  %1593 = vmatprep.subr.bf16.mxu1 %v2995_v56 }
 0x3b5   : > { %1553 = vmatpush1.bf16.msra.mxu0 %v3000_v58  ;;  %1594 = vmatpush1.bf16.msra.mxu1 %v3003_v59 }
 0x3b6   : > { %1554 = vmatprep.subr.bf16.mxu0 %v3008_v60  ;;  %1595 = vmatprep.subr.bf16.mxu1 %v3013_v61 }
 0x3b9   : > { %1555 = vmatpush1.bf16.msra.mxu0 %v3016_v62  ;;  %1596 = vmatpush1.bf16.msra.mxu1 %v3019_v63 }
 0x3ba   : > { %1556 = vmatprep.subr.bf16.mxu0 %v3026_v2  ;;  %1597 = vmatprep.subr.bf16.mxu1 %v3029_v3 }
 0x3bd   : > { %1557 = vmatpush1.bf16.msra.mxu0 %v3036_v5  ;;  %1598 = vmatpush1.bf16.msra.mxu1 %v3039_v6 }
 0x3be   : > { %1558 = vmatprep.subr.bf16.mxu0 %v3044_v7  ;;  %1599 = vmatprep.subr.bf16.mxu1 %v3047_v8 }
 0x3c1   : > { %1559 = vmatpush1.bf16.msra.mxu0 %v3050_v9  ;;  %1600 = vmatpush1.bf16.msra.mxu1 %v3055_v10 }
 0x3c2   : > { %1560 = vmatprep.subr.bf16.mxu0 %v3060_v14  ;;  %1601 = vmatprep.subr.bf16.mxu1 %v3063_v15 }
 0x3c5   : > { %1561 = vmatpush1.bf16.msra.mxu0 %v3070_v17  ;;  %1602 = vmatpush1.bf16.msra.mxu1 %v3073_v18 }
 0x3c6   : > { %1562 = vmatprep.subr.bf16.mxu0 %v3078_v19  ;;  %1603 = vmatprep.subr.bf16.mxu1 %v3081_v20 }
 0x3c9   : > { %1563 = vmatpush1.bf16.msra.mxu0 %v3086_v21  ;;  %1604 = vmatpush1.bf16.msra.mxu1 %v3089_v22 }
 0x3ca   : > { %1668 = vmatprep.subr.bf16.mxu0 %v2962_v44  ;;  %1709 = vmatprep.subr.bf16.mxu1 %v2965_v45 }
 0x47f   : > { %v1462_v49 = vpop.f32.mrb[28].mxu0  ;;  %v1503_v50 = vpop.f32.mrb[28].mxu1 }
 0x480   : > { %v1510_v0 = vadd.f32 %v1462_v49, %v1423_v47  ;;  %v1512_v13 = vadd.f32 %v1503_v50, %v1425_v48  ;;  %v1464_v16 = vpop.f32.mrb[29].mxu0  ;;  %v1505_v32 = vpop.f32.mrb[29].mxu1  ;;  %v3342_v47 = vld [vmem:[%s2889_s16] ss:$16 sps:$4 sm:$0xff]   ;;  %v3350_v48 = vld [vmem:[%s2889_s16 + $0x24] ss:$16 sps:$4 sm:$0xff]  }
 0x481   : > { %v1511_v33 = vadd.f32 %v1464_v16, %v1424_v51  ;;  %v1513_v35 = vadd.f32 %v1505_v32, %v1426_v52  ;;  %v1466_v34 = vpop.f32.mrb[30].mxu0  ;;  %v1507_v44 = vpop.f32.mrb[30].mxu1  ;;  %v3354_v49 = vld [vmem:[%s2889_s16 + $0x2c] ss:$16 sps:$4 sm:$0xff]   ;;  %v3360_v50 = vld [vmem:[%s2889_s16 + $0x20] ss:$16 sps:$4 sm:$0xff]  }
 0x482   : > { %v2254_v36 = vmul.f32 -1.442695, %v1510_v0  ;;  %v1467_v45 = vpop.f32.mrb[31].mxu0  ;;  %v1508_v37 = vpop.f32.mrb[31].mxu1  ;;  %v3364_v51 = vld [vmem:[%s2889_s16 + $0x28] ss:$16 sps:$4 sm:$0xff]  }
 0x483   : > { %v2255_v42 = vmul.f32 -1.442695, %v1511_v33  ;;  %v2256_v4 = vmul.f32 -1.442695, %v1513_v35  ;;  %v3416_v37 = vld [vmem:[%s2889_s16 + $0x44] ss:$16 sps:$4 sm:$0xff]  }
 0x484   : > { %2484 = vpow2.f32 %v2254_v36 }
 0x485   : > { %2486 = vpow2.f32 %v2255_v42  ;;  %v3420_v42 = vld [vmem:[%s2889_s16 + $0x4c] ss:$16 sps:$4 sm:$0xff]  }
 0x486   : > { %2488 = vpow2.f32 %v2256_v4  ;;  %v3424_v4 = vld [vmem:[%s2889_s16 + $0x40] ss:$16 sps:$4 sm:$0xff]  }
 0x487   : > { %2490 = vtanh.f32 %v1512_v13 }
 0x48e   : > { %v2485_v46 = vpop.eup %2484 }
 0x48f   : > { %v2487_v41 = vpop.eup %2486  ;;  %v1517_v53 = vadd.f32 1.0, %v2485_v46  ;;  %v3428_v46 = vld [vmem:[%s2889_s16 + $0x48] ss:$16 sps:$4 sm:$0xff]  }
 0x490   : > { %v1523_v54 = vadd.f32 1.0, %v2487_v41  ;;  %v2489_v43 = vpop.eup %2488  ;;  %v3432_v41 = vld [vmem:[%s2889_s16 + $0x64] ss:$16 sps:$4 sm:$0xff]  }
 0x491   : > { %2492 = vrcp.f32 %v1517_v53  ;;  %v2491_v11 = vpop.eup %2490  ;;  %v1530_v25 = vadd.f32 1.0, %v2489_v43  ;;  %v3436_v53 = vld [vmem:[%s2889_s16 + $0x6c] ss:$16 sps:$4 sm:$0xff]   ;;  %v3444_v43 = vld [vmem:[%s2889_s16 + $0x68] ss:$16 sps:$4 sm:$0xff]  }
 0x492   : > { %2494 = vrcp.f32 %v1523_v54  ;;  %v3440_v54 = vld [vmem:[%s2889_s16 + $0x60] ss:$16 sps:$4 sm:$0xff]  }
 0x493   : > { %2496 = vrcp.f32 %v1530_v25  ;;  %v3464_v25 = vld [vmem:[%s2889_s16 + $0xa4] ss:$16 sps:$4 sm:$0xff]  }
 0x49b   : > { %v2493_v23 = vpop.eup %2492 }
 0x49c   : > { %v2495_v29 = vpop.eup %2494  ;;  %v1534_v30 = vmul.f32 %v2493_v23, %v2491_v11  ;;  %v3448_v11 = vld [vmem:[%s2889_s16 + $0x84] ss:$16 sps:$4 sm:$0xff]   ;;  %v3452_v23 = vld [vmem:[%s2889_s16 + $0x8c] ss:$16 sps:$4 sm:$0xff]  }
 0x49d   : > { %v1533_v31 = vmul.f32 %v2495_v29, %v3296_v12  ;;  %v2497_v24 = vpop.eup %2496  ;;  %v3346_v12 = vld [vmem:[%s2889_s16 + $0x8] ss:$16 sps:$4 sm:$0xff]   ;;  %v3456_v29 = vld [vmem:[%s2889_s16 + $0x80] ss:$16 sps:$4 sm:$0xff]  }
 0x49f   : > { %v3338_v26 = vadd.f32 %v1534_v30, %v1533_v31  ;;  %v3460_v30 = vld [vmem:[%s2889_s16 + $0x88] ss:$16 sps:$4 sm:$0xff]   ;;  %v3468_v31 = vld [vmem:[%s2889_s16 + $0xac] ss:$16 sps:$4 sm:$0xff]  }
 0x4a1   : > { %2498 = vtanh.f32 %v3338_v26 }
 0x4ab   : > { %v2499_v57 = vpop.eup %2498 }
 0x4ac   : > { %v1537_v28 = vmul.f32 %v2499_v57, %v2497_v24  ;;  %v3476_v24 = vld [vmem:[%s2889_s16 + $0xa8] ss:$16 sps:$4 sm:$0xff]   ;;  %v3480_v57 = vld [vmem:[%s2889_s16 + $0xc4] ss:$16 sps:$4 sm:$0xff]  }
 0x4ae   : > { %1539 = vst [vmem:[#allocation2 + $0x18] sm:$0xff] %v1537_v28  ;;  %v1547_v27 = vpack.c.bf16 %v1537_v28, %v1537_v28  ;;  %v3484_v28 = vld [vmem:[%s2889_s16 + $0xcc] ss:$16 sps:$4 sm:$0xff]  }
 0x4b0   : > { %1581 = vmatmul.mubr.bf16.vlgmr.msra.gmra.mrb[32].mxu0 %v1547_v27  ;;  %1622 = vmatmul.mubr.bf16.vlgmr.msra.gmra.mrb[32].mxu1 %v1547_v27  ;;  %v3488_v27 = vld [vmem:[%s2889_s16 + $0xc0] ss:$16 sps:$4 sm:$0xff]  }
 0x4b1   : > { %1669 = vmatpush1.bf16.msra.mxu0 %v3342_v47  ;;  %1710 = vmatpush1.bf16.msra.mxu1 %v3346_v12 }
 0x4b2   : > { %1670 = vmatprep.subr.bf16.mxu0 %v3350_v48  ;;  %1711 = vmatprep.subr.bf16.mxu1 %v3354_v49 }
 0x4b3   : > { %1700 = vmatprep.mubr.bf16.mxu0 %v3616_v1  ;;  %1741 = vmatprep.mubr.bf16.mxu1 %v3616_v1 }
 0x4b5   : > { %1671 = vmatpush1.bf16.msra.mxu0 %v3360_v50  ;;  %1712 = vmatpush1.bf16.msra.mxu1 %v3364_v51 }
 0x4b6   : > { %1672 = vmatprep.subr.bf16.mxu0 %v2990_v55  ;;  %1713 = vmatprep.subr.bf16.mxu1 %v2995_v56  ;;  %v3392_v55 = vld [vmem:[%s2889_s16 + $0x4] ss:$16 sps:$4 sm:$0xff]   ;;  %v3396_v56 = vld [vmem:[%s2889_s16 + $0xc] ss:$16 sps:$4 sm:$0xff]  }
 0x4b9   : > { %1673 = vmatpush1.bf16.msra.mxu0 %v3000_v58  ;;  %1714 = vmatpush1.bf16.msra.mxu1 %v3003_v59  ;;  %v1543_v58 = vunpack.c.l.bf16 %v3182_v38  ;;  %v1545_v59 = vunpack.c.l.bf16 %v3185_v40 }
 0x4ba   : > { %1674 = vmatprep.subr.bf16.mxu0 %v3008_v60  ;;  %1715 = vmatprep.subr.bf16.mxu1 %v3013_v61 }
 0x4bd   : > { %1675 = vmatpush1.bf16.msra.mxu0 %v3016_v62  ;;  %1716 = vmatpush1.bf16.msra.mxu1 %v3019_v63  ;;  %v1544_v62 = vunpack.c.h.bf16 %v3182_v38  ;;  %v1546_v63 = vunpack.c.h.bf16 %v3185_v40 }
 0x4be   : > { %1676 = vmatprep.subr.bf16.mxu0 %v3026_v2  ;;  %1717 = vmatprep.subr.bf16.mxu1 %v3029_v3 }
 0x4c1   : > { %1677 = vmatpush1.bf16.msra.mxu0 %v3036_v5  ;;  %1718 = vmatpush1.bf16.msra.mxu1 %v3039_v6 }
 0x4c2   : > { %1678 = vmatprep.subr.bf16.mxu0 %v3044_v7  ;;  %1719 = vmatprep.subr.bf16.mxu1 %v3047_v8 }
 0x4c5   : > { %1679 = vmatpush1.bf16.msra.mxu0 %v3050_v9  ;;  %1720 = vmatpush1.bf16.msra.mxu1 %v3055_v10 }
 0x4c6   : > { %1680 = vmatprep.subr.bf16.mxu0 %v3060_v14  ;;  %1721 = vmatprep.subr.bf16.mxu1 %v3063_v15 }
 0x4c9   : > { %1681 = vmatpush1.bf16.msra.mxu0 %v3070_v17  ;;  %1722 = vmatpush1.bf16.msra.mxu1 %v3073_v18 }
 0x4ca   : > { %1682 = vmatprep.subr.bf16.mxu0 %v3078_v19  ;;  %1723 = vmatprep.subr.bf16.mxu1 %v3081_v20 }
 0x4cd   : > { %1683 = vmatpush1.bf16.msra.mxu0 %v3086_v21  ;;  %1724 = vmatpush1.bf16.msra.mxu1 %v3089_v22 }
 0x4ce   : > { %1788 = vmatprep.subr.bf16.mxu0 %v3392_v55  ;;  %1829 = vmatprep.subr.bf16.mxu1 %v3396_v56 }
 0x583   : > { %v1582_v60 = vpop.f32.mrb[32].mxu0  ;;  %v1623_v61 = vpop.f32.mrb[32].mxu1 }
 0x584   : > { %v1630_v2 = vadd.f32 %v1582_v60, %v1543_v58  ;;  %v1632_v3 = vadd.f32 %v1623_v61, %v1545_v59  ;;  %v1584_v5 = vpop.f32.mrb[33].mxu0  ;;  %v1625_v6 = vpop.f32.mrb[33].mxu1  ;;  %v3492_v58 = vld [vmem:[%s2889_s16 + $0xc8] ss:$16 sps:$4 sm:$0xff]   ;;  %v3496_v59 = vld [vmem:[%s2889_s16 + $0xe4] ss:$16 sps:$4 sm:$0xff]  }
 0x585   : > { %v1631_v7 = vadd.f32 %v1584_v5, %v1544_v62  ;;  %v1633_v8 = vadd.f32 %v1625_v6, %v1546_v63  ;;  %v1586_v9 = vpop.f32.mrb[34].mxu0  ;;  %v1627_v10 = vpop.f32.mrb[34].mxu1  ;;  %v3500_v60 = vld [vmem:[%s2889_s16 + $0xec] ss:$16 sps:$4 sm:$0xff]   ;;  %v3504_v61 = vld [vmem:[%s2889_s16 + $0xe0] ss:$16 sps:$4 sm:$0xff]  }
 0x586   : > { %v2257_v14 = vmul.f32 -1.442695, %v1630_v2  ;;  %v1587_v15 = vpop.f32.mrb[35].mxu0  ;;  %v1628_v17 = vpop.f32.mrb[35].mxu1  ;;  %v3508_v62 = vld [vmem:[%s2889_s16 + $0xe8] ss:$16 sps:$4 sm:$0xff]  }
 0x587   : > { %v2258_v18 = vmul.f32 -1.442695, %v1631_v7  ;;  %v2259_v19 = vmul.f32 -1.442695, %v1633_v8  ;;  %v3617_v63 = vld [vmem:[#allocation14_spill] sm:$0xff] }
 0x588   : > { %2500 = vpow2.f32 %v2257_v14  ;;  %v1663_v2 = vunpack.c.l.bf16 %v3617_v63  ;;  %v1664_v8 = vunpack.c.h.bf16 %v3617_v63 }
 0x589   : > { %2502 = vpow2.f32 %v2258_v18 }
 0x58a   : > { %2504 = vpow2.f32 %v2259_v19 }
 0x58b   : > { %2506 = vtanh.f32 %v1632_v3  ;;  %v3618_v3 = vld [vmem:[#allocation15_spill] sm:$0xff] }
 0x58c   : > { %v1665_v5 = vunpack.c.l.bf16 %v3618_v3  ;;  %v1666_v9 = vunpack.c.h.bf16 %v3618_v3 }
 0x592   : > { %v2501_v20 = vpop.eup %2500 }
 0x593   : > { %v2503_v21 = vpop.eup %2502  ;;  %v1637_v22 = vadd.f32 1.0, %v2501_v20 }
 0x594   : > { %v1643_v38 = vadd.f32 1.0, %v2503_v21  ;;  %v2505_v40 = vpop.eup %2504 }
 0x595   : > { %2508 = vrcp.f32 %v1637_v22  ;;  %v2507_v52 = vpop.eup %2506  ;;  %v1650_v32 = vadd.f32 1.0, %v2505_v40 }
 0x596   : > { %2510 = vrcp.f32 %v1643_v38 }
 0x597   : > { %2512 = vrcp.f32 %v1650_v32 }
 0x59f   : > { %v2509_v0 = vpop.eup %2508 }
 0x5a0   : > { %v2511_v13 = vpop.eup %2510  ;;  %v1654_v16 = vmul.f32 %v2509_v0, %v2507_v52 }
 0x5a1   : > { %v1653_v33 = vmul.f32 %v2511_v13, %v3338_v26  ;;  %v2513_v34 = vpop.eup %2512  ;;  %v3472_v26 = vld [vmem:[%s2889_s16 + $0xa0] ss:$16 sps:$4 sm:$0xff]  }
 0x5a3   : > { %v3404_v35 = vadd.f32 %v1654_v16, %v1653_v33 }
 0x5a5   : > { %2514 = vtanh.f32 %v3404_v35 }
 0x5af   : > { %v2515_v44 = vpop.eup %2514 }
 0x5b0   : > { %v1657_v36 = vmul.f32 %v2515_v44, %v2513_v34 }
 0x5b2   : > { %1659 = vst [vmem:[#allocation2 + $0x20] sm:$0xff] %v1657_v36  ;;  %v1667_v45 = vpack.c.bf16 %v1657_v36, %v1657_v36 }
 0x5b4   : > { %1701 = vmatmul.mubr.bf16.vlgmr.msra.gmra.mrb[36].mxu0 %v1667_v45  ;;  %1742 = vmatmul.mubr.bf16.vlgmr.msra.gmra.mrb[36].mxu1 %v1667_v45 }
 0x5b5   : > { %1789 = vmatpush1.bf16.msra.mxu0 %v3342_v47  ;;  %1830 = vmatpush1.bf16.msra.mxu1 %v3346_v12 }
 0x5b6   : > { %1790 = vmatprep.subr.bf16.mxu0 %v3350_v48  ;;  %1831 = vmatprep.subr.bf16.mxu1 %v3354_v49 }
 0x5b7   : > { %1820 = vmatprep.mubr.bf16.mxu0 %v3616_v1  ;;  %1861 = vmatprep.mubr.bf16.mxu1 %v3616_v1 }
 0x5b9   : > { %1791 = vmatpush1.bf16.msra.mxu0 %v3360_v50  ;;  %1832 = vmatpush1.bf16.msra.mxu1 %v3364_v51 }
 0x5ba   : > { %1792 = vmatprep.subr.bf16.mxu0 %v3416_v37  ;;  %1833 = vmatprep.subr.bf16.mxu1 %v3420_v42 }
 0x5bd   : > { %1793 = vmatpush1.bf16.msra.mxu0 %v3424_v4  ;;  %1834 = vmatpush1.bf16.msra.mxu1 %v3428_v46 }
 0x5be   : > { %1794 = vmatprep.subr.bf16.mxu0 %v3432_v41  ;;  %1835 = vmatprep.subr.bf16.mxu1 %v3436_v53 }
 0x5c1   : > { %1795 = vmatpush1.bf16.msra.mxu0 %v3440_v54  ;;  %1836 = vmatpush1.bf16.msra.mxu1 %v3444_v43 }
 0x5c2   : > { %1796 = vmatprep.subr.bf16.mxu0 %v3448_v11  ;;  %1837 = vmatprep.subr.bf16.mxu1 %v3452_v23 }
 0x5c5   : > { %1797 = vmatpush1.bf16.msra.mxu0 %v3456_v29  ;;  %1838 = vmatpush1.bf16.msra.mxu1 %v3460_v30 }
 0x5c6   : > { %1798 = vmatprep.subr.bf16.mxu0 %v3464_v25  ;;  %1839 = vmatprep.subr.bf16.mxu1 %v3468_v31 }
 0x5c9   : > { %1799 = vmatpush1.bf16.msra.mxu0 %v3472_v26  ;;  %1840 = vmatpush1.bf16.msra.mxu1 %v3476_v24 }
 0x5ca   : > { %1800 = vmatprep.subr.bf16.mxu0 %v3480_v57  ;;  %1841 = vmatprep.subr.bf16.mxu1 %v3484_v28 }
 0x5cd   : > { %1801 = vmatpush1.bf16.msra.mxu0 %v3488_v27  ;;  %1842 = vmatpush1.bf16.msra.mxu1 %v3492_v58 }
 0x5ce   : > { %1802 = vmatprep.subr.bf16.mxu0 %v3496_v59  ;;  %1843 = vmatprep.subr.bf16.mxu1 %v3500_v60 }
 0x5d1   : > { %1803 = vmatpush1.bf16.msra.mxu0 %v3504_v61  ;;  %1844 = vmatpush1.bf16.msra.mxu1 %v3508_v62 }
 0x5d2   : > { %1908 = vmatprep.subr.bf16.mxu0 %v3392_v55  ;;  %1949 = vmatprep.subr.bf16.mxu1 %v3396_v56 }
 0x687   : > { %v1702_v6 = vpop.f32.mrb[36].mxu0  ;;  %v1743_v7 = vpop.f32.mrb[36].mxu1 }
 0x688   : > { %v1750_v10 = vadd.f32 %v1702_v6, %v1663_v2  ;;  %v1752_v14 = vadd.f32 %v1743_v7, %v1665_v5  ;;  %v1704_v15 = vpop.f32.mrb[37].mxu0  ;;  %v1745_v17 = vpop.f32.mrb[37].mxu1 }
 0x689   : > { %v1751_v18 = vadd.f32 %v1704_v15, %v1664_v8  ;;  %v1753_v19 = vadd.f32 %v1745_v17, %v1666_v9  ;;  %v1706_v20 = vpop.f32.mrb[38].mxu0  ;;  %v1747_v55 = vpop.f32.mrb[38].mxu1  ;;  %v3621_v17 = vld [vmem:[#allocation18_spill] sm:$0xff] }
 0x68a   : > { %v2260_v21 = vmul.f32 -1.442695, %v1750_v10  ;;  %v1707_v56 = vpop.f32.mrb[39].mxu0  ;;  %v1748_v22 = vpop.f32.mrb[39].mxu1 }
 0x68b   : > { %v2261_v38 = vmul.f32 -1.442695, %v1751_v18  ;;  %v2262_v40 = vmul.f32 -1.442695, %v1753_v19  ;;  %v1905_v18 = vunpack.c.l.bf16 %v3621_v17 }
 0x68c   : > { %2516 = vpow2.f32 %v2260_v21  ;;  %v1906_v21 = vunpack.c.h.bf16 %v3621_v17 }
 0x68d   : > { %2518 = vpow2.f32 %v2261_v38 }
 0x68e   : > { %2520 = vpow2.f32 %v2262_v40 }
 0x68f   : > { %2522 = vtanh.f32 %v1752_v14  ;;  %v3620_v14 = vld [vmem:[#allocation17_spill] sm:$0xff] }
 0x690   : > { %v1903_v15 = vunpack.c.l.bf16 %v3620_v14  ;;  %v1904_v55 = vunpack.c.h.bf16 %v3620_v14 }
 0x696   : > { %v2517_v52 = vpop.eup %2516 }
 0x697   : > { %v2519_v0 = vpop.eup %2518  ;;  %v1757_v13 = vadd.f32 1.0, %v2517_v52 }
 0x698   : > { %v1763_v16 = vadd.f32 1.0, %v2519_v0  ;;  %v2521_v32 = vpop.eup %2520 }
 0x699   : > { %2524 = vrcp.f32 %v1757_v13  ;;  %v2523_v33 = vpop.eup %2522  ;;  %v1770_v45 = vadd.f32 1.0, %v2521_v32 }
 0x69a   : > { %2526 = vrcp.f32 %v1763_v16 }
 0x69b   : > { %2528 = vrcp.f32 %v1770_v45 }
 0x6a3   : > { %v2525_v34 = vpop.eup %2524 }
 0x6a4   : > { %v2527_v44 = vpop.eup %2526  ;;  %v1774_v36 = vmul.f32 %v2525_v34, %v2523_v33 }
 0x6a5   : > { %v1773_v63 = vmul.f32 %v2527_v44, %v3404_v35  ;;  %v2529_v3 = vpop.eup %2528 }
 0x6a7   : > { %v3518_v2 = vadd.f32 %v1774_v36, %v1773_v63 }
 0x6a9   : > { %2530 = vtanh.f32 %v3518_v2 }
 0x6b3   : > { %v2531_v5 = vpop.eup %2530 }
 0x6b4   : > { %v1777_v6 = vmul.f32 %v2531_v5, %v2529_v3 }
 0x6b6   : > { %1779 = vst [vmem:[#allocation2 + $0x28] sm:$0xff] %v1777_v6  ;;  %v1787_v7 = vpack.c.bf16 %v1777_v6, %v1777_v6 }
 0x6b8   : > { %1821 = vmatmul.mubr.bf16.vlgmr.msra.gmra.mrb[40].mxu0 %v1787_v7  ;;  %1862 = vmatmul.mubr.bf16.vlgmr.msra.gmra.mrb[40].mxu1 %v1787_v7 }
 0x6b9   : > { %1909 = vmatpush1.bf16.msra.mxu0 %v3342_v47  ;;  %1950 = vmatpush1.bf16.msra.mxu1 %v3346_v12  ;;  %v3619_v47 = vld [vmem:[#allocation16_spill] sm:$0xff] }
 0x6ba   : > { %1910 = vmatprep.subr.bf16.mxu0 %v3350_v48  ;;  %1951 = vmatprep.subr.bf16.mxu1 %v3354_v49  ;;  %v1785_v12 = vunpack.c.l.bf16 %v3619_v47 }
 0x6bb   : > { %1940 = vmatprep.mubr.bf16.mxu0 %v3616_v1  ;;  %1981 = vmatprep.mubr.bf16.mxu1 %v3616_v1  ;;  %v1783_v1 = vunpack.c.l.bf16 %v3198_v39 }
 0x6bd   : > { %1911 = vmatpush1.bf16.msra.mxu0 %v3360_v50  ;;  %1952 = vmatpush1.bf16.msra.mxu1 %v3364_v51  ;;  %v1784_v50 = vunpack.c.h.bf16 %v3198_v39  ;;  %v1786_v51 = vunpack.c.h.bf16 %v3619_v47 }
 0x6be   : > { %1912 = vmatprep.subr.bf16.mxu0 %v3416_v37  ;;  %1953 = vmatprep.subr.bf16.mxu1 %v3420_v42 }
 0x6c1   : > { %1913 = vmatpush1.bf16.msra.mxu0 %v3424_v4  ;;  %1954 = vmatpush1.bf16.msra.mxu1 %v3428_v46 }
 0x6c2   : > { %1914 = vmatprep.subr.bf16.mxu0 %v3432_v41  ;;  %1955 = vmatprep.subr.bf16.mxu1 %v3436_v53 }
 0x6c5   : > { %1915 = vmatpush1.bf16.msra.mxu0 %v3440_v54  ;;  %1956 = vmatpush1.bf16.msra.mxu1 %v3444_v43 }
 0x6c6   : > { %1916 = vmatprep.subr.bf16.mxu0 %v3448_v11  ;;  %1957 = vmatprep.subr.bf16.mxu1 %v3452_v23 }
 0x6c9   : > { %1917 = vmatpush1.bf16.msra.mxu0 %v3456_v29  ;;  %1958 = vmatpush1.bf16.msra.mxu1 %v3460_v30 }
 0x6ca   : > { %1918 = vmatprep.subr.bf16.mxu0 %v3464_v25  ;;  %1959 = vmatprep.subr.bf16.mxu1 %v3468_v31 }
 0x6cd   : > { %1919 = vmatpush1.bf16.msra.mxu0 %v3472_v26  ;;  %1960 = vmatpush1.bf16.msra.mxu1 %v3476_v24 }
 0x6ce   : > { %1920 = vmatprep.subr.bf16.mxu0 %v3480_v57  ;;  %1961 = vmatprep.subr.bf16.mxu1 %v3484_v28 }
 0x6d1   : > { %1921 = vmatpush1.bf16.msra.mxu0 %v3488_v27  ;;  %1962 = vmatpush1.bf16.msra.mxu1 %v3492_v58 }
 0x6d2   : > { %1922 = vmatprep.subr.bf16.mxu0 %v3496_v59  ;;  %1963 = vmatprep.subr.bf16.mxu1 %v3500_v60 }
 0x6d5   : > { %1923 = vmatpush1.bf16.msra.mxu0 %v3504_v61  ;;  %1964 = vmatpush1.bf16.msra.mxu1 %v3508_v62 }
 0x78b   : > { %v1822_v48 = vpop.f32.mrb[40].mxu0  ;;  %v1863_v49 = vpop.f32.mrb[40].mxu1 }
 0x78c   : > { %v1870_v35 = vadd.f32 %v1822_v48, %v1783_v1  ;;  %v1872_v37 = vadd.f32 %v1863_v49, %v1785_v12  ;;  %v1824_v42 = vpop.f32.mrb[41].mxu0  ;;  %v1865_v4 = vpop.f32.mrb[41].mxu1 }
 0x78d   : > { %v1871_v46 = vadd.f32 %v1824_v42, %v1784_v50  ;;  %v1873_v41 = vadd.f32 %v1865_v4, %v1786_v51  ;;  %v1826_v53 = vpop.f32.mrb[42].mxu0  ;;  %v1867_v54 = vpop.f32.mrb[42].mxu1  ;;  %v2270_v42 = vld [vmem:[%s3595_s4] ss:$0 sm:$0xff] (!%p2269_p3) }
 0x78e   : > { %v2263_v43 = vmul.f32 -1.442695, %v1870_v35  ;;  %v1827_v11 = vpop.f32.mrb[43].mxu0  ;;  %v1868_v23 = vpop.f32.mrb[43].mxu1  ;;  %v2024_v4 = vld [vmem:[#allocation2 + $0x20] sm:$0xff] (!%p2269_p3)  ;;  %v2025_v54 = vld [vmem:[#allocation2 + $0x28] sm:$0xff] (!%p2269_p3) }
 0x78f   : > { %v2264_v29 = vmul.f32 -1.442695, %v1871_v46  ;;  %v2265_v30 = vmul.f32 -1.442695, %v1873_v41  ;;  %v2036_v41 = vmul.f32 (!%p2269_p3), %v2270_v42, %v2024_v4  ;;  %v2037_v11 = vmul.f32 (!%p2269_p3), %v2270_v42, %v2025_v54  ;;  %v2271_v23 = vld [vmem:[#allocation5] ss:$0 sm:$0xff] (!%p2269_p3) }
 0x790   : > { %2532 = vpow2.f32 %v2263_v43 }
 0x791   : > { %2534 = vpow2.f32 %v2264_v29  ;;  %2040 = vadd.xlane.f32.xlu0 (!%p2269_p3), %v2036_v41 }
 0x792   : > { %2536 = vpow2.f32 %v2265_v30 }
 0x793   : > { %2538 = vtanh.f32 %v1872_v37 }
 0x795   : > { %2042 = vadd.xlane.f32.xlu0 (!%p2269_p3), %v2037_v11 }
 0x79a   : > { %v2533_v25 = vpop.eup %2532 }
 0x79b   : > { %v2535_v31 = vpop.eup %2534  ;;  %v1877_v39 = vadd.f32 1.0, %v2533_v25 }
 0x79c   : > { %v1883_v26 = vadd.f32 1.0, %v2535_v31  ;;  %v2537_v24 = vpop.eup %2536 }
 0x79d   : > { %2540 = vrcp.f32 %v1877_v39  ;;  %v2539_v57 = vpop.eup %2538  ;;  %v1890_v59 = vadd.f32 1.0, %v2537_v24 }
 0x79e   : > { %2542 = vrcp.f32 %v1883_v26 }
 0x79f   : > { %2544 = vrcp.f32 %v1890_v59 }
 0x7a7   : > { %v2541_v28 = vpop.eup %2540 }
 0x7a8   : > { %v2543_v27 = vpop.eup %2542  ;;  %v1894_v58 = vmul.f32 %v2541_v28, %v2539_v57 }
 0x7a9   : > { %v1893_v60 = vmul.f32 %v2543_v27, %v3518_v2  ;;  %v2545_v62 = vpop.eup %2544 }
 0x7ab   : > { %v1895_v61 = vadd.f32 %v1894_v58, %v1893_v60 }
 0x7ad   : > { %2546 = vtanh.f32 %v1895_v61 }
 0x7b7   : > { %v2547_v8 = vpop.eup %2546 }
 0x7b8   : > { %v1897_v9 = vmul.f32 %v2547_v8, %v2545_v62 }
 0x7ba   : > { %1899 = vst [vmem:[#allocation2 + $0x30] sm:$0xff] %v1897_v9  ;;  %v1907_v10 = vpack.c.bf16 %v1897_v9, %v1897_v9 }
 0x7bc   : > { %1941 = vmatmul.mubr.bf16.vlgmr.msra.gmra.mrb[44].mxu0 %v1907_v10  ;;  %1982 = vmatmul.mubr.bf16.vlgmr.msra.gmra.mrb[44].mxu1 %v1907_v10 }
 0x7c1   : > { %v2026_v37 = vld [vmem:[#allocation2 + $0x30] sm:$0xff] (!%p2269_p3) }
 0x7c2   : > { %v2038_v46 = vmul.f32 (!%p2269_p3), %v2270_v42, %v2026_v37 }
 0x7c4   : > { %2044 = vadd.xlane.f32.xlu1 (!%p2269_p3), %v2038_v46 }
 0x81e   : > { %v2041_v30 = vpop.xlane.xlu0 (!%p2269_p3), %2040 }
 0x81f   : > { %v2054_v31 = vadd.f32 (!%p2269_p3), %v2271_v23, %v2041_v30 }
 0x821   : > { %2059 = vst.msk [vmem:[%s3597_s6] sm:$0xff] (!%p2269_p3), %vm2058_vm0, %v2054_v31 }
 0x822   : > { %v2043_v26 = vpop.xlane.xlu0 (!%p2269_p3), %2042 }
 0x823   : > { %v2055_v57 = vadd.f32 (!%p2269_p3), %v2271_v23, %v2043_v26 }
 0x825   : > { %2060 = vst.msk [vmem:[%s3597_s6 + $0x8] sm:$0xff] (!%p2269_p3), %vm2058_vm0, %v2055_v57 }
 0x851   : > { %v2045_v29 = vpop.xlane.xlu1 (!%p2269_p3), %2044 }
 0x852   : > { %v2056_v25 = vadd.f32 (!%p2269_p3), %v2271_v23, %v2045_v29 }
 0x854   : > { %2061 = vst.msk [vmem:[%s3597_s6 + $0x10] sm:$0xff] (!%p2269_p3), %vm2058_vm0, %v2056_v25 }
 0x88f   : > { %v1942_v19 = vpop.f32.mrb[44].mxu0  ;;  %v1983_v20 = vpop.f32.mrb[44].mxu1 }
 0x890   : > { %v1990_v56 = vadd.f32 %v1942_v19, %v1903_v15  ;;  %v1992_v22 = vadd.f32 %v1983_v20, %v1905_v18  ;;  %v1944_v38 = vpop.f32.mrb[45].mxu0  ;;  %v1985_v40 = vpop.f32.mrb[45].mxu1 }
 0x891   : > { %v1991_v52 = vadd.f32 %v1944_v38, %v1904_v55  ;;  %v1993_v0 = vadd.f32 %v1985_v40, %v1906_v21  ;;  %v1946_v13 = vpop.f32.mrb[46].mxu0  ;;  %v1987_v16 = vpop.f32.mrb[46].mxu1 }
 0x892   : > { %v2266_v32 = vmul.f32 -1.442695, %v1990_v56  ;;  %v1947_v33 = vpop.f32.mrb[47].mxu0  ;;  %v1988_v34 = vpop.f32.mrb[47].mxu1 }
 0x893   : > { %v2267_v44 = vmul.f32 -1.442695, %v1991_v52  ;;  %v2268_v36 = vmul.f32 -1.442695, %v1993_v0 }
 0x894   : > { %2548 = vpow2.f32 %v2266_v32 }
 0x895   : > { %2550 = vpow2.f32 %v2267_v44 }
 0x896   : > { %2552 = vpow2.f32 %v2268_v36 }
 0x897   : > { %2554 = vtanh.f32 %v1992_v22 }
 0x89e   : > { %v2549_v45 = vpop.eup %2548 }
 0x89f   : > { %v2551_v63 = vpop.eup %2550  ;;  %v1997_v2 = vadd.f32 1.0, %v2549_v45 }
 0x8a0   : > { %v2003_v3 = vadd.f32 1.0, %v2551_v63  ;;  %v2553_v5 = vpop.eup %2552 }
 0x8a1   : > { %2556 = vrcp.f32 %v1997_v2  ;;  %v2555_v6 = vpop.eup %2554  ;;  %v2010_v12 = vadd.f32 1.0, %v2553_v5 }
 0x8a2   : > { %2558 = vrcp.f32 %v2003_v3 }
 0x8a3   : > { %2560 = vrcp.f32 %v2010_v12 }
 0x8ab   : > { %v2557_v7 = vpop.eup %2556 }
 0x8ac   : > { %v2559_v1 = vpop.eup %2558  ;;  %v2014_v47 = vmul.f32 %v2557_v7, %v2555_v6 }
 0x8ad   : > { %v2013_v48 = vmul.f32 %v2559_v1, %v1895_v61  ;;  %v2561_v50 = vpop.eup %2560 }
 0x8af   : > { %v2015_v49 = vadd.f32 %v2014_v47, %v2013_v48 }
 0x8b1   : > { %2562 = vtanh.f32 %v2015_v49 }
 0x8b8   : > { %2023 = sbr.rel (%p2269_p3) target bundleno = 2393 (0x959), region = 90 }
 0x8bb   : > { %v2563_v51 = vpop.eup %2562 }
 0x8bc   : > { %v2017_v35 = vmul.f32 %v2563_v51, %v2561_v50 }
 0x8be   : > { %2019 = vst [vmem:[#allocation2 + $0x38] sm:$0xff] %v2017_v35 }
 0x8c5   : > { %v2027_v53 = vld [vmem:[#allocation2 + $0x38] sm:$0xff] }
 0x8c6   : > { %v2039_v43 = vmul.f32 %v2270_v42, %v2027_v53 }
 0x8c8   : > { %2046 = vadd.xlane.f32.xlu1 %v2039_v43 }
 0x955   : > { %v2047_v39 = vpop.xlane.xlu1 %2046 }
 0x956   : > { %v2057_v24 = vadd.f32 %v2271_v23, %v2047_v39 }
 0x958   : > { %2062 = vst.msk [vmem:[%s3597_s6 + $0x18] sm:$0xff] %vm2058_vm0, %v2057_v24 }
 0x959 PF: > { %p21_p6 = scmp.ge.s32.totalorder %s2763_s27, 6   ;;  %s3622_s23 = smov %s2688_s24 }
 0x95a   : > { %s3623_s24 = smov %s2692_s25  ;;  %s3624_s25 = smov %s2773_s30 }
 0x95b   : > { %s3625_s26 = smov %s2763_s27  ;;  %23 = sbr.rel (!%p21_p6) target bundleno = 8 (0x8), region = 156 }
 0x962   :  { %2074 = vsyncpa [#allocation7], 1 }
 0x963   :  { %2076 = vsyncpa [#allocation7 + $0x1], 1 }
 0x964   :  { %2077 = vsyncpa [#allocation9], 1 }
 0x965   :  { %2079 = vsyncpa [#allocation9 + $0x1], 1 }
 0x966   :  { %2080 = vsyncmov [#allocation4] }
 0x969   :  { %s2081_s9 = vpop.sfrf %2080 }
 0x96a   :  { %p2274_p1 = scmp.ne.s32.totalorder %s2081_s9, 0 }
 0x96c   :  { %2085 = shalt.err (%p2274_p1)  }

</bundles_post_ra>
